<compile_context>
chip_gen: v7x
topology: tpu7x:2x2x1
jax: 0.10.0
libtpu: 0.0.40
codegen_flags: <defaults>
</compile_context>

<pallas_src>
import functools

import numpy as np
import jax
import jax.numpy as jnp
from jax import lax
from jax.experimental import pallas as pl
from jax.experimental.pallas import tpu as pltpu


# ----------------------------- small helpers -----------------------------

def _round_up(v, m):
    return (v + m - 1) // m * m


def _nbytes(shape, dtype):
    return int(np.prod(shape)) * np.dtype(dtype).itemsize


def _vmem_limit(block_bytes):
    # generous headroom for intermediates + double buffering; v7x-safe cap.
    return int(min(64 * 2 ** 20, max(16 * 2 ** 20, 4 * int(block_bytes))))


def _rep_spec(a):
    # full-array block, replicated across the grid (resident, DMA'd once)
    nd = a.ndim
    return pl.BlockSpec(a.shape, lambda *g, _nd=nd: (0,) * _nd)


def _layer_spec(a):
    # stream one GPT-2 layer's slice per step of the (graph, layer) grid
    nd = a.ndim
    return pl.BlockSpec((1,) + a.shape[1:],
                        lambda b, l, _nd=nd: (l,) + (0,) * (_nd - 1))


# ----------------------------- in-kernel helpers -----------------------------

def _layer_norm(x, g, b, eps=1e-5):
    mu = jnp.mean(x, axis=-1, keepdims=True)
    var = jnp.mean((x - mu) ** 2, axis=-1, keepdims=True)
    return (x - mu) * lax.rsqrt(var + eps) * g + b


def _gelu_new(x):
    return 0.5 * x * (1.0 + jnp.tanh(float(np.sqrt(2.0 / np.pi))
                                     * (x + 0.044715 * x * x * x)))


# ----------------------------- Pallas kernels -----------------------------

def _gat_kernel(xs_ref, xt_ref, adj_ref, w_ref, asrc_ref, adst_ref, b_ref,
                *rest, with_pmi):
    # Dense multi-head GAT layer (heads averaged, PyG-style attention) over one
    # destination-row tile:
    #   e[i, j] = LeakyReLU_0.2( a_dst . (W x_i) + a_src . (W x_j) )   (edge j -> i)
    #   alpha   = softmax_j over neighbours of i (self-loops included)
    #   out_i   = mean_over_heads( sum_j alpha[i, j] * (W x_j) ) + bias
    # If with_pmi, predict_missing_info is fused (gamma*(r==0) vanishes):
    #   m_v = h_v + tanh(W_b1 h_v + W_b2 h_N_v + b) - h_N_v
    if with_pmi:
        wb1_ref, wb2_ref, bb_ref, o_ref = rest
    else:
        (o_ref,) = rest

    heads = asrc_ref.shape[0]
    n, din = xs_ref.shape
    tm = xt_ref.shape[0]

    # additive edge mask for this dst-row tile (adjacency streamed as int8)
    adj = adj_ref[...].astype(jnp.float32)                       # (tm, n)
    neg_mask = jnp.where(adj > 0.0, 0.0, -1e30)

    # head-major batched projections: bf16 MXU operands, f32 accumulation
    w = w_ref[...]                                               # (heads, din, H) bf16
    xs_b = jnp.broadcast_to(xs_ref[...].astype(jnp.bfloat16), (heads, n, din))
    xt_b = jnp.broadcast_to(xt_ref[...].astype(jnp.bfloat16), (heads, tm, din))
    hs3 = jnp.einsum("hnd,hde->hne", xs_b, w,
                     preferred_element_type=jnp.float32)         # (heads, n, H)
    ht3 = jnp.einsum("hnd,hde->hne", xt_b, w,
                     preferred_element_type=jnp.float32)         # (heads, tm, H)

    # attention logits: VPU multiply + lane reduce (no 1-row matmuls)
    d = jnp.sum(ht3 * adst_ref[...], axis=-1, keepdims=True)     # (heads, tm, 1)
    s = jnp.sum(hs3 * asrc_ref[...], axis=-1)[:, None, :]        # (heads, 1, n)
    e = d + s                                                    # (heads, tm, n)
    e = jnp.where(e > 0, e, 0.2 * e)                             # LeakyReLU(0.2)
    e = e + neg_mask[None, :, :]
    e = e - jnp.max(e, axis=-1, keepdims=True)
    p = jnp.exp(e)
    inv = pl.reciprocal(jnp.sum(p, axis=-1, keepdims=True), approx=True)
    ctx = jnp.einsum("htn,hnd->htd", (p * inv).astype(jnp.bfloat16),
                     hs3.astype(jnp.bfloat16),
                     preferred_element_type=jnp.float32)         # (heads, tm, H)

    out = ctx[0]
    for hh in range(1, heads):
        out = out + ctx[hh]
    out = out * (1.0 / heads) + b_ref[...]                       # heads averaged

    if with_pmi:
        hv = xt_ref[...]                                         # h_v (tm, H) f32
        beta = jnp.tanh(
            jnp.dot(hv.astype(jnp.bfloat16), wb1_ref[...],
                    preferred_element_type=jnp.float32)
            + jnp.dot(out.astype(jnp.bfloat16), wb2_ref[...],
                      preferred_element_type=jnp.float32)
            + bb_ref[...])
        o_ref[...] = hv + beta - out
    else:
        o_ref[...] = out


def _gpt_combine_kernel(xg_ref, wpe_ref, mask_ref,
                        ln1g_ref, ln1b_ref, wqkv_ref, bqkv_ref, wo_ref, bo_ref,
                        ln2g_ref, ln2b_ref, wfc_ref, bfc_ref, wp2_ref, bp2_ref,
                        lnfg_ref, lnfb_ref, cw1_ref, cw2_ref, cb_ref,
                        o_ref, x_scr, *, n_head):
    # grid = (graph, layer): one GPT-2 block's weights are streamed per step,
    # the running sequence lives in the VMEM scratch x_scr.
    l = pl.program_id(1)
    S, H = x_scr.shape
    hd = H // n_head
    scale = 1.0 / float(np.sqrt(hd))

    @pl.when(l == 0)
    def _():
        x_scr[...] = xg_ref[0] + wpe_ref[...]

    x = x_scr[...]

    # --- attention block (pre-LN, fused QKV, head-major batched) ---
    h = _layer_norm(x, ln1g_ref[0], ln1b_ref[0])
    h_b = jnp.broadcast_to(h.astype(jnp.bfloat16), (3 * n_head, S, H))
    qkv3 = jnp.einsum("bsh,bhe->bse", h_b, wqkv_ref[0],
                      preferred_element_type=jnp.float32) + bqkv_ref[0]   # (3nh,S,hd)
    q = qkv3[:n_head] * scale
    k = qkv3[n_head:2 * n_head]
    v = qkv3[2 * n_head:]
    s = jnp.einsum("hqd,hkd->hqk", q.astype(jnp.bfloat16), k.astype(jnp.bfloat16),
                   preferred_element_type=jnp.float32)                    # (nh,S,S)
    s = s + mask_ref[...][None, :, :]
    s = s - jnp.max(s, axis=-1, keepdims=True)
    p = jnp.exp(s)
    inv = pl.reciprocal(jnp.sum(p, axis=-1, keepdims=True), approx=True)
    ctx = jnp.einsum("hqk,hkd->hqd", (p * inv).astype(jnp.bfloat16),
                     v.astype(jnp.bfloat16),
                     preferred_element_type=jnp.float32)                  # (nh,S,hd)
    attn_h = jnp.einsum("hsd,hde->hse", ctx.astype(jnp.bfloat16), wo_ref[0],
                        preferred_element_type=jnp.float32)               # (nh,S,H)
    attn = attn_h[0]
    for i in range(1, n_head):
        attn = attn + attn_h[i]
    x = x + attn + bo_ref[0]

    # --- MLP block ---
    h2 = _layer_norm(x, ln2g_ref[0], ln2b_ref[0])
    m = _gelu_new(jnp.dot(h2.astype(jnp.bfloat16), wfc_ref[0],
                          preferred_element_type=jnp.float32) + bfc_ref[0])
    x = x + (jnp.dot(m.astype(jnp.bfloat16), wp2_ref[0],
                     preferred_element_type=jnp.float32) + bp2_ref[0])
    x_scr[...] = x

    # --- final LayerNorm + combine Linear (concat split into two matmuls) ---
    @pl.when(l == pl.num_programs(1) - 1)
    def _():
        x_gpt = _layer_norm(x, lnfg_ref[...], lnfb_ref[...])
        xg = xg_ref[0]
        o_ref[0] = (jnp.dot(xg.astype(jnp.bfloat16), cw1_ref[...],
                            preferred_element_type=jnp.float32)
                    + jnp.dot(x_gpt.astype(jnp.bfloat16), cw2_ref[...],
                              preferred_element_type=jnp.float32)
                    + cb_ref[...])


# ----------------------------- pallas_call wrappers -----------------------------

def pallas_gat(x_full, adj, gp, pmi=None, *, tm):
    n_pad, din = x_full.shape
    heads = gp["a_src"].shape[0]
    H = gp["a_src"].shape[-1]
    grid_n = n_pad // tm

    args = [x_full, x_full, adj, gp["w"], gp["a_src"], gp["a_dst"], gp["bias"]]
    in_specs = [
        pl.BlockSpec((n_pad, din), lambda i: (0, 0)),     # all source nodes (resident)
        pl.BlockSpec((tm, din), lambda i: (i, 0)),        # dst-row tile
        pl.BlockSpec((tm, n_pad), lambda i: (i, 0)),      # int8 adjacency row tile
        _rep_spec(gp["w"]), _rep_spec(gp["a_src"]),
        _rep_spec(gp["a_dst"]), _rep_spec(gp["bias"]),
    ]
    if pmi is not None:
        args += [pmi["wb1"], pmi["wb2"], pmi["bb"]]
        in_specs += [_rep_spec(pmi["wb1"]), _rep_spec(pmi["wb2"]), _rep_spec(pmi["bb"])]

    blk_bytes = (_nbytes((n_pad, din), jnp.float32) + _nbytes((tm, din), jnp.float32)
                 + _nbytes((tm, n_pad), jnp.int8)
                 + sum(_nbytes(a.shape, a.dtype) for a in args[3:])
                 + _nbytes((tm, H), jnp.float32))
    inter_bytes = 4 * (heads * n_pad * H + heads * tm * H
                       + 2 * heads * tm * n_pad + 2 * tm * H)
    flops = grid_n * 2 * (n_pad + tm) * din * heads * H + 2 * heads * n_pad * n_pad * H
    trans = heads * n_pad * n_pad + n_pad * H

    return pl.pallas_call(
        functools.partial(_gat_kernel, with_pmi=pmi is not None),
        grid=(grid_n,),
        in_specs=in_specs,
        out_specs=pl.BlockSpec((tm, H), lambda i: (i, 0)),
        out_shape=jax.ShapeDtypeStruct((n_pad, H), jnp.float32),
        compiler_params=pltpu.CompilerParams(
            dimension_semantics=("parallel",),
            vmem_limit_bytes=_vmem_limit(2 * blk_bytes + inter_bytes)),
        cost_estimate=pl.CostEstimate(flops=int(flops), transcendentals=int(trans),
                                      bytes_accessed=int(blk_bytes) * grid_n),
    )(*args)


def pallas_gpt_combine(x_pad, params, n_head):
    B, S, H = x_pad.shape
    g = params["gpt"]
    L = g["wqkv"].shape[0]
    if S > params["wpe"].shape[0]:
        raise ValueError(f"max_nodes={S} exceeds max_pos={params['wpe'].shape[0]}")
    wpe = params["wpe"][:S]
    pos = jnp.arange(S)
    causal = jnp.where(pos[:, None] >= pos[None, :], 0.0, -1e30).astype(jnp.float32)

    args = (x_pad, wpe, causal,
            g["ln1g"], g["ln1b"], g["wqkv"], g["bqkv"], g["wo"], g["bo"],
            g["ln2g"], g["ln2b"], g["wfc"], g["bfc"], g["wp2"], g["bp2"],
            params["lnf_g"], params["lnf_b"],
            params["cw1"], params["cw2"], params["cb"])
    in_specs = ([pl.BlockSpec((1, S, H), lambda b, l: (b, 0, 0)),
                 pl.BlockSpec((S, H), lambda b, l: (0, 0)),
                 pl.BlockSpec((S, S), lambda b, l: (0, 0))]
                + [_layer_spec(a) for a in args[3:15]]
                + [_rep_spec(a) for a in args[15:]])

    blk_bytes = (2 * _nbytes((1, S, H), jnp.float32) + _nbytes((S, H), jnp.float32)
                 + _nbytes((S, S), jnp.float32)
                 + sum(_nbytes((1,) + a.shape[1:], a.dtype) for a in args[3:15])
                 + sum(_nbytes(a.shape, a.dtype) for a in args[15:])
                 + _nbytes((S, H), jnp.float32))
    inter_bytes = 4 * (3 * S * H + 2 * n_head * S * S + S * 4 * H + 4 * S * H)
    per_graph = L * (24 * S * H * H + 4 * S * S * H) + 4 * S * H * H
    flops = B * per_graph
    trans = B * L * (n_head * S * S + 8 * S * H)

    return pl.pallas_call(
        functools.partial(_gpt_combine_kernel, n_head=n_head),
        grid=(B, L),
        in_specs=in_specs,
        out_specs=pl.BlockSpec((1, S, H), lambda b, l: (b, 0, 0)),
        out_shape=jax.ShapeDtypeStruct((B, S, H), jnp.float32),
        scratch_shapes=[pltpu.VMEM((S, H), jnp.float32)],
        compiler_params=pltpu.CompilerParams(
            dimension_semantics=("parallel", "arbitrary"),
            vmem_limit_bytes=_vmem_limit(2 * blk_bytes + inter_bytes)),
        cost_estimate=pl.CostEstimate(flops=int(flops), transcendentals=int(trans),
                                      bytes_accessed=int(blk_bytes) * B * L),
    )(*args)


# ----------------------------- parameters -----------------------------

def init_params(key, input_dim, hidden_dim, num_heads=2, n_layer=2, n_head=2,
                max_pos=32):
    keys = jax.random.split(key, 32)
    it = iter(keys)

    def nrm(shape, dtype=jnp.bfloat16, scale=0.02):
        return (scale * jax.random.normal(next(it), shape, dtype=jnp.float32)).astype(dtype)

    H = hidden_dim
    L = n_layer
    assert H % n_head == 0
    hd = H // n_head
    p = {}
    # GAT layers: head-major weight stacks (heads, Din, H) in bf16 (MXU operands);
    # attention vectors / biases stay f32 (VPU / elementwise path).
    p["gat1"] = dict(w=nrm((num_heads, input_dim, H)),
                     a_src=nrm((num_heads, 1, H), jnp.float32),
                     a_dst=nrm((num_heads, 1, H), jnp.float32),
                     bias=jnp.zeros((1, H), jnp.float32))
    p["gat2"] = dict(w=nrm((2, H, H)),
                     a_src=nrm((2, 1, H), jnp.float32),
                     a_dst=nrm((2, 1, H), jnp.float32),
                     bias=jnp.zeros((1, H), jnp.float32))
    # predict_missing_info: gamma path multiplies zeros -> omitted (bit-identical);
    # beta linears kept split (no concat feeding the matmul), bb = b_beta1 + b_beta2.
    p["pmi"] = dict(wb1=nrm((H, H)), wb2=nrm((H, H)),
                    bb=jnp.zeros((1, H), jnp.float32))
    p["wpe"] = nrm((max_pos, H), jnp.float32)
    # GPT-2 blocks stacked on a leading layer axis (streamed one layer per grid
    # step); QKV and output projection stored head-major to avoid in-kernel
    # reshapes/transposes.
    p["gpt"] = dict(
        ln1g=jnp.ones((L, 1, H), jnp.float32), ln1b=jnp.zeros((L, 1, H), jnp.float32),
        wqkv=nrm((L, 3 * n_head, H, hd)),
        bqkv=jnp.zeros((L, 3 * n_head, 1, hd), jnp.float32),
        wo=nrm((L, n_head, hd, H)), bo=jnp.zeros((L, 1, H), jnp.float32),
        ln2g=jnp.ones((L, 1, H), jnp.float32), ln2b=jnp.zeros((L, 1, H), jnp.float32),
        wfc=nrm((L, H, 4 * H)), bfc=jnp.zeros((L, 1, 4 * H), jnp.float32),
        wp2=nrm((L, 4 * H, H)), bp2=jnp.zeros((L, 1, H), jnp.float32))
    p["lnf_g"] = jnp.ones((1, H), jnp.float32)
    p["lnf_b"] = jnp.zeros((1, H), jnp.float32)
    p["cw1"] = nrm((H, H))
    p["cw2"] = nrm((H, H))
    p["cb"] = jnp.zeros((1, H), jnp.float32)
    return p


# ----------------------------- forward -----------------------------

def mggpt_forward(params, x, edge_index, h_c, batch, hidden_dim, n_head=2):
    N, din = x.shape
    H = hidden_dim
    if batch is None:
        batch = np.zeros(N, np.int64)

    # pad the node axis to a row-tile multiple; adjacency streamed as int8
    tm = min(128, _round_up(N, 8))
    n_pad = _round_up(N, tm)
    x_pad = jnp.zeros((n_pad, din), jnp.float32).at[:N].set(x)
    adj = jnp.zeros((n_pad, n_pad), jnp.int8)
    adj = adj.at[edge_index[1], edge_index[0]].set(1)          # adj[dst, src] = 1
    adj = adj.at[jnp.arange(N), jnp.arange(N)].set(1)          # self-loops (real nodes)

    # GAT(input) -> GAT(hidden) + predict_missing_info, row-tiled over dst nodes
    x1 = pallas_gat(x_pad, adj, params["gat1"], tm=tm)                      # (n_pad, H)
    x_gnn = pallas_gat(x1, adj, params["gat2"], pmi=params["pmi"], tm=tm)[:N]

    # pad per-graph node features: static host-side (numpy) index math + one scatter
    batch_np = np.asarray(batch)
    num_graphs = int(batch_np.max()) + 1
    counts = np.bincount(batch_np, minlength=num_graphs)
    max_nodes = int(counts.max())
    order = np.argsort(batch_np, kind="stable")
    starts = np.zeros(num_graphs, np.int64)
    starts[1:] = np.cumsum(counts)[:-1]
    ranks = np.arange(N) - np.repeat(starts, counts)
    pos = np.empty(N, np.int64)
    pos[order] = ranks
    pad_idx = jnp.asarray(batch_np.astype(np.int64) * max_nodes + pos, dtype=jnp.int32)

    flat = jnp.zeros((num_graphs * max_nodes, H), jnp.float32).at[pad_idx].set(x_gnn)
    padded = flat.reshape(num_graphs, max_nodes, H)

    # wpe + streamed GPT-2 blocks + final LN + combine Linear (one kernel)
    combined = pallas_gpt_combine(padded, params, n_head)                   # (B, S, H)

    # unpad back to node order: one gather
    output = combined.reshape(num_graphs * max_nodes, H)[pad_idx]
    if output.shape[0] != x_gnn.shape[0]:
        raise ValueError(f"Shape mismatch: x_gnn={x_gnn.shape}, x_gpt={output.shape}")
    # dropout -> identity (eval)

    if h_c is None:
        h = output
        c = jnp.zeros_like(h)
    else:
        h, c = h_c
        h = output
    return h, c


# ----------------------------- main -----------------------------

if __name__ == "__main__":
    input_dim, hidden_dim, num_heads = 16, 32, 2
    key = jax.random.PRNGKey(0)
    kp, kx = jax.random.split(key)
    params = init_params(kp, input_dim, hidden_dim, num_heads=num_heads,
                         n_layer=2, n_head=num_heads)

    N = 8
    x = jax.random.normal(kx, (N, input_dim), dtype=jnp.float32)
    # two graphs (4 nodes each): bidirectional ring per graph
    src = np.array([0, 1, 2, 3, 1, 2, 3, 0, 4, 5, 6, 7, 5, 6, 7, 4])
    dst = np.array([1, 2, 3, 0, 0, 1, 2, 3, 5, 6, 7, 4, 4, 5, 6, 7])
    edge_index = jnp.asarray(np.stack([src, dst]), dtype=jnp.int32)
    batch = np.array([0, 0, 0, 0, 1, 1, 1, 1])

    @jax.jit
    def run(params, x, edge_index):
        return mggpt_forward(params, x, edge_index, None, batch, hidden_dim,
                             n_head=num_heads)

    h, c = run(params, x, edge_index)
    jax.block_until_ready((h, c))
    assert h.shape == (N, hidden_dim) and c.shape == (N, hidden_dim)
    assert bool(jnp.all(jnp.isfinite(h)))
    print("KERNEL_OK")
</pallas_src>

<mosaic_0001>
module attributes {stable_mosaic.version = 11 : i64} {
  func.func @_gat_kernel(%arg0: i32, %arg1: memref<8x32xf32, #tpu.memory_space<vmem>>, %arg2: memref<8x32xf32, #tpu.memory_space<vmem>>, %arg3: memref<8x8xi8, #tpu.memory_space<vmem>>, %arg4: memref<2x32x32xbf16, #tpu.memory_space<vmem>>, %arg5: memref<2x1x32xf32, #tpu.memory_space<vmem>>, %arg6: memref<2x1x32xf32, #tpu.memory_space<vmem>>, %arg7: memref<1x32xf32, #tpu.memory_space<vmem>>, %arg8: memref<32x32xbf16, #tpu.memory_space<vmem>>, %arg9: memref<32x32xbf16, #tpu.memory_space<vmem>>, %arg10: memref<1x32xf32, #tpu.memory_space<vmem>>, %arg11: memref<8x32xf32, #tpu.memory_space<vmem>>) attributes {dimension_semantics = [#tpu.dimension_semantics<parallel>], iteration_bounds = array<i64: 1>, scalar_prefetch = 0 : i64, scratch_operands = 0 : i64, tpu.core_type = #tpu.core_type<tc>, window_params = [{pipeline_mode = #tpu.pipeline_mode<synchronous>, transform_indices = @transform_0, window_bounds = array<i64: 8, 32>}, {transform_indices = @transform_1, window_bounds = array<i64: 8, 32>}, {transform_indices = @transform_2, window_bounds = array<i64: 8, 8>}, {pipeline_mode = #tpu.pipeline_mode<synchronous>, transform_indices = @transform_3, window_bounds = array<i64: 2, 32, 32>}, {pipeline_mode = #tpu.pipeline_mode<synchronous>, transform_indices = @transform_4, window_bounds = array<i64: 2, 1, 32>}, {pipeline_mode = #tpu.pipeline_mode<synchronous>, transform_indices = @transform_5, window_bounds = array<i64: 2, 1, 32>}, {pipeline_mode = #tpu.pipeline_mode<synchronous>, transform_indices = @transform_6, window_bounds = array<i64: 1, 32>}, {pipeline_mode = #tpu.pipeline_mode<synchronous>, transform_indices = @transform_7, window_bounds = array<i64: 32, 32>}, {pipeline_mode = #tpu.pipeline_mode<synchronous>, transform_indices = @transform_8, window_bounds = array<i64: 32, 32>}, {pipeline_mode = #tpu.pipeline_mode<synchronous>, transform_indices = @transform_9, window_bounds = array<i64: 1, 32>}, {transform_indices = @transform_10, window_bounds = array<i64: 8, 32>}]} {
    %c0 = arith.constant 0 : index
    %c0_0 = arith.constant 0 : index
    %0 = vector.load %arg3[%c0, %c0_0] : memref<8x8xi8, #tpu.memory_space<vmem>>, vector<8x8xi8>
    %1 = arith.sitofp %0 : vector<8x8xi8> to vector<8x8xf32>
    %cst = arith.constant 0.000000e+00 : f32
    %2 = vector.broadcast %cst : f32 to vector<8x8xf32>
    %3 = arith.cmpf ogt, %1, %2 : vector<8x8xf32>
    %cst_1 = arith.constant 0.000000e+00 : f32
    %cst_2 = arith.constant -1.000000e+30 : f32
    %4 = vector.broadcast %cst_1 : f32 to vector<8x8xf32>
    %5 = vector.broadcast %cst_2 : f32 to vector<8x8xf32>
    %6 = arith.select %3, %4, %5 : vector<8x8xi1>, vector<8x8xf32>
    %c0_3 = arith.constant 0 : index
    %c0_4 = arith.constant 0 : index
    %c0_5 = arith.constant 0 : index
    %7 = vector.load %arg4[%c0_3, %c0_4, %c0_5] : memref<2x32x32xbf16, #tpu.memory_space<vmem>>, vector<2x32x32xbf16>
    %c0_6 = arith.constant 0 : index
    %c0_7 = arith.constant 0 : index
    %8 = vector.load %arg1[%c0_6, %c0_7] : memref<8x32xf32, #tpu.memory_space<vmem>>, vector<8x32xf32>
    %9 = arith.truncf %8 : vector<8x32xf32> to vector<8x32xbf16>
    %10 = vector.shape_cast %9 : vector<8x32xbf16> to vector<1x8x32xbf16>
    %11 = vector.broadcast %10 : vector<1x8x32xbf16> to vector<2x8x32xbf16>
    %c0_8 = arith.constant 0 : index
    %c0_9 = arith.constant 0 : index
    %12 = vector.load %arg2[%c0_8, %c0_9] : memref<8x32xf32, #tpu.memory_space<vmem>>, vector<8x32xf32>
    %13 = arith.truncf %12 : vector<8x32xf32> to vector<8x32xbf16>
    %14 = vector.shape_cast %13 : vector<8x32xbf16> to vector<1x8x32xbf16>
    %15 = vector.broadcast %14 : vector<1x8x32xbf16> to vector<2x8x32xbf16>
    "tpu.trace_start"() <{level = 10 : i32, message = "hnd,hde->hne"}> : () -> ()
    %cst_10 = arith.constant dense<0.000000e+00> : vector<2x8x32xf32>
    %16 = tpu.matmul %11, %7, %cst_10 {dimension_numbers = #tpu.dot_dimension_numbers<[2], [1], [1], [2], [0, 0, 0, 1, 1, 2], [0], [0]>} : vector<2x8x32xbf16>, vector<2x32x32xbf16>, vector<2x8x32xf32> -> vector<2x8x32xf32>
    %cst_11 = arith.constant dense<0.000000e+00> : vector<2x8x32xf32>
    %17 = tpu.matmul %15, %7, %cst_11 {dimension_numbers = #tpu.dot_dimension_numbers<[2], [1], [1], [2], [0, 0, 0, 1, 1, 2], [0], [0]>} : vector<2x8x32xbf16>, vector<2x32x32xbf16>, vector<2x8x32xf32> -> vector<2x8x32xf32>
    "tpu.trace_stop"() : () -> ()
    %c0_12 = arith.constant 0 : index
    %c0_13 = arith.constant 0 : index
    %c0_14 = arith.constant 0 : index
    %18 = vector.load %arg6[%c0_12, %c0_13, %c0_14] : memref<2x1x32xf32, #tpu.memory_space<vmem>>, vector<2x1x32xf32>
    %19 = vector.broadcast %18 : vector<2x1x32xf32> to vector<2x8x32xf32>
    %20 = arith.mulf %17, %19 : vector<2x8x32xf32>
    %cst_15 = arith.constant dense<0.000000e+00> : vector<2x8xf32>
    %21 = vector.multi_reduction <add>, %20, %cst_15 [2] : vector<2x8x32xf32> to vector<2x8xf32>
    %22 = vector.shape_cast %21 : vector<2x8xf32> to vector<2x8x1xf32>
    %c0_16 = arith.constant 0 : index
    %c0_17 = arith.constant 0 : index
    %c0_18 = arith.constant 0 : index
    %23 = vector.load %arg5[%c0_16, %c0_17, %c0_18] : memref<2x1x32xf32, #tpu.memory_space<vmem>>, vector<2x1x32xf32>
    %24 = vector.broadcast %23 : vector<2x1x32xf32> to vector<2x8x32xf32>
    %25 = arith.mulf %16, %24 : vector<2x8x32xf32>
    %cst_19 = arith.constant dense<0.000000e+00> : vector<2x8xf32>
    %26 = vector.multi_reduction <add>, %25, %cst_19 [2] : vector<2x8x32xf32> to vector<2x8xf32>
    %27 = vector.shape_cast %26 : vector<2x8xf32> to vector<2x1x8xf32>
    %28 = vector.broadcast %22 : vector<2x8x1xf32> to vector<2x8x8xf32>
    %29 = vector.broadcast %27 : vector<2x1x8xf32> to vector<2x8x8xf32>
    %30 = arith.addf %28, %29 : vector<2x8x8xf32>
    %cst_20 = arith.constant 0.000000e+00 : f32
    %31 = vector.broadcast %cst_20 : f32 to vector<2x8x8xf32>
    %32 = arith.cmpf ogt, %30, %31 : vector<2x8x8xf32>
    %cst_21 = arith.constant 2.000000e-01 : f32
    %33 = vector.broadcast %cst_21 : f32 to vector<2x8x8xf32>
    %34 = arith.mulf %33, %30 : vector<2x8x8xf32>
    %35 = arith.select %32, %30, %34 : vector<2x8x8xi1>, vector<2x8x8xf32>
    %36 = vector.shape_cast %6 : vector<8x8xf32> to vector<1x8x8xf32>
    %37 = vector.broadcast %36 : vector<1x8x8xf32> to vector<2x8x8xf32>
    %38 = arith.addf %35, %37 : vector<2x8x8xf32>
    %cst_22 = arith.constant dense<0xFF800000> : vector<2x8xf32>
    %39 = vector.multi_reduction <maximumf>, %38, %cst_22 [2] : vector<2x8x8xf32> to vector<2x8xf32>
    %40 = vector.shape_cast %39 : vector<2x8xf32> to vector<2x8x1xf32>
    %41 = vector.broadcast %40 : vector<2x8x1xf32> to vector<2x8x8xf32>
    %42 = arith.subf %38, %41 : vector<2x8x8xf32>
    %43 = math.exp %42 : vector<2x8x8xf32>
    %cst_23 = arith.constant dense<0.000000e+00> : vector<2x8xf32>
    %44 = vector.multi_reduction <add>, %43, %cst_23 [2] : vector<2x8x8xf32> to vector<2x8xf32>
    %45 = vector.shape_cast %44 : vector<2x8xf32> to vector<2x8x1xf32>
    %46 = tpu.reciprocal %45 {approx = true} : vector<2x8x1xf32> -> vector<2x8x1xf32>
    %47 = vector.broadcast %46 : vector<2x8x1xf32> to vector<2x8x8xf32>
    %48 = arith.mulf %43, %47 : vector<2x8x8xf32>
    %49 = arith.truncf %48 : vector<2x8x8xf32> to vector<2x8x8xbf16>
    %50 = arith.truncf %16 : vector<2x8x32xf32> to vector<2x8x32xbf16>
    "tpu.trace_start"() <{level = 10 : i32, message = "htn,hnd->htd"}> : () -> ()
    %cst_24 = arith.constant dense<0.000000e+00> : vector<2x8x32xf32>
    %51 = tpu.matmul %49, %50, %cst_24 {dimension_numbers = #tpu.dot_dimension_numbers<[2], [1], [1], [2], [0, 0, 0, 1, 1, 2], [0], [0]>} : vector<2x8x8xbf16>, vector<2x8x32xbf16>, vector<2x8x32xf32> -> vector<2x8x32xf32>
    "tpu.trace_stop"() : () -> ()
    %52 = vector.extract_strided_slice %51 {offsets = [0, 0, 0], sizes = [1, 8, 32], strides = [1, 1, 1]} : vector<2x8x32xf32> to vector<1x8x32xf32>
    %53 = vector.shape_cast %52 : vector<1x8x32xf32> to vector<8x32xf32>
    %54 = vector.extract_strided_slice %51 {offsets = [1, 0, 0], sizes = [1, 8, 32], strides = [1, 1, 1]} : vector<2x8x32xf32> to vector<1x8x32xf32>
    %55 = vector.shape_cast %54 : vector<1x8x32xf32> to vector<8x32xf32>
    %56 = arith.addf %53, %55 : vector<8x32xf32>
    %cst_25 = arith.constant 5.000000e-01 : f32
    %57 = vector.broadcast %cst_25 : f32 to vector<8x32xf32>
    %58 = arith.mulf %56, %57 : vector<8x32xf32>
    %c0_26 = arith.constant 0 : index
    %c0_27 = arith.constant 0 : index
    %59 = vector.load %arg7[%c0_26, %c0_27] : memref<1x32xf32, #tpu.memory_space<vmem>>, vector<1x32xf32>
    %60 = vector.broadcast %59 : vector<1x32xf32> to vector<8x32xf32>
    %61 = arith.addf %58, %60 : vector<8x32xf32>
    %c0_28 = arith.constant 0 : index
    %c0_29 = arith.constant 0 : index
    %62 = vector.load %arg2[%c0_28, %c0_29] : memref<8x32xf32, #tpu.memory_space<vmem>>, vector<8x32xf32>
    %63 = arith.truncf %62 : vector<8x32xf32> to vector<8x32xbf16>
    %c0_30 = arith.constant 0 : index
    %c0_31 = arith.constant 0 : index
    %64 = vector.load %arg8[%c0_30, %c0_31] : memref<32x32xbf16, #tpu.memory_space<vmem>>, vector<32x32xbf16>
    %cst_32 = arith.constant dense<0.000000e+00> : vector<8x32xf32>
    %65 = tpu.matmul %63, %64, %cst_32 {dimension_numbers = #tpu.dot_dimension_numbers<[1], [0], [0], [1], [0, 0, 1, 1], [], []>} : vector<8x32xbf16>, vector<32x32xbf16>, vector<8x32xf32> -> vector<8x32xf32>
    %66 = arith.truncf %61 : vector<8x32xf32> to vector<8x32xbf16>
    %c0_33 = arith.constant 0 : index
    %c0_34 = arith.constant 0 : index
    %67 = vector.load %arg9[%c0_33, %c0_34] : memref<32x32xbf16, #tpu.memory_space<vmem>>, vector<32x32xbf16>
    %cst_35 = arith.constant dense<0.000000e+00> : vector<8x32xf32>
    %68 = tpu.matmul %66, %67, %cst_35 {dimension_numbers = #tpu.dot_dimension_numbers<[1], [0], [0], [1], [0, 0, 1, 1], [], []>} : vector<8x32xbf16>, vector<32x32xbf16>, vector<8x32xf32> -> vector<8x32xf32>
    %69 = arith.addf %65, %68 : vector<8x32xf32>
    %c0_36 = arith.constant 0 : index
    %c0_37 = arith.constant 0 : index
    %70 = vector.load %arg10[%c0_36, %c0_37] : memref<1x32xf32, #tpu.memory_space<vmem>>, vector<1x32xf32>
    %71 = vector.broadcast %70 : vector<1x32xf32> to vector<8x32xf32>
    %72 = arith.addf %69, %71 : vector<8x32xf32>
    %73 = math.tanh %72 : vector<8x32xf32>
    %74 = arith.addf %62, %73 : vector<8x32xf32>
    %75 = arith.subf %74, %61 : vector<8x32xf32>
    %c0_38 = arith.constant 0 : index
    %c0_39 = arith.constant 0 : index
    %76 = vector.load %arg11[%c0_38, %c0_39] : memref<8x32xf32, #tpu.memory_space<vmem>>, vector<8x32xf32>
    tpu.vector_store %arg11[%c0_38, %c0_39], %75 {strides = array<i32>} : memref<8x32xf32, #tpu.memory_space<vmem>>, vector<8x32xf32>,
    return
  }
  func.func @transform_0(%arg0: i32) -> (i32, i32) {
    %c0_i32 = arith.constant 0 : i32
    %c0_i32_0 = arith.constant 0 : i32
    %c0_i32_1 = arith.constant 0 : i32
    return %c0_i32, %c0_i32_0 : i32, i32
  }
  func.func @transform_1(%arg0: i32) -> (i32, i32) {
    %c0_i32 = arith.constant 0 : i32
    %c0_i32_0 = arith.constant 0 : i32
    return %arg0, %c0_i32 : i32, i32
  }
  func.func @transform_2(%arg0: i32) -> (i32, i32) {
    %c0_i32 = arith.constant 0 : i32
    %c0_i32_0 = arith.constant 0 : i32
    return %arg0, %c0_i32 : i32, i32
  }
  func.func @transform_3(%arg0: i32) -> (i32, i32, i32) {
    %c0_i32 = arith.constant 0 : i32
    %c0_i32_0 = arith.constant 0 : i32
    %c0_i32_1 = arith.constant 0 : i32
    %c0_i32_2 = arith.constant 0 : i32
    return %c0_i32, %c0_i32_0, %c0_i32_1 : i32, i32, i32
  }
  func.func @transform_4(%arg0: i32) -> (i32, i32, i32) {
    %c0_i32 = arith.constant 0 : i32
    %c0_i32_0 = arith.constant 0 : i32
    %c0_i32_1 = arith.constant 0 : i32
    %c0_i32_2 = arith.constant 0 : i32
    return %c0_i32, %c0_i32_0, %c0_i32_1 : i32, i32, i32
  }
  func.func @transform_5(%arg0: i32) -> (i32, i32, i32) {
    %c0_i32 = arith.constant 0 : i32
    %c0_i32_0 = arith.constant 0 : i32
    %c0_i32_1 = arith.constant 0 : i32
    %c0_i32_2 = arith.constant 0 : i32
    return %c0_i32, %c0_i32_0, %c0_i32_1 : i32, i32, i32
  }
  func.func @transform_6(%arg0: i32) -> (i32, i32) {
    %c0_i32 = arith.constant 0 : i32
    %c0_i32_0 = arith.constant 0 : i32
    %c0_i32_1 = arith.constant 0 : i32
    return %c0_i32, %c0_i32_0 : i32, i32
  }
  func.func @transform_7(%arg0: i32) -> (i32, i32) {
    %c0_i32 = arith.constant 0 : i32
    %c0_i32_0 = arith.constant 0 : i32
    %c0_i32_1 = arith.constant 0 : i32
    return %c0_i32, %c0_i32_0 : i32, i32
  }
  func.func @transform_8(%arg0: i32) -> (i32, i32) {
    %c0_i32 = arith.constant 0 : i32
    %c0_i32_0 = arith.constant 0 : i32
    %c0_i32_1 = arith.constant 0 : i32
    return %c0_i32, %c0_i32_0 : i32, i32
  }
  func.func @transform_9(%arg0: i32) -> (i32, i32) {
    %c0_i32 = arith.constant 0 : i32
    %c0_i32_0 = arith.constant 0 : i32
    %c0_i32_1 = arith.constant 0 : i32
    return %c0_i32, %c0_i32_0 : i32, i32
  }
  func.func @transform_10(%arg0: i32) -> (i32, i32) {
    %c0_i32 = arith.constant 0 : i32
    %c0_i32_0 = arith.constant 0 : i32
    return %arg0, %c0_i32 : i32, i32
  }
}

module attributes {stable_mosaic.version = 11 : i64} {
  func.func @_gat_kernel(%arg0: i32, %arg1: memref<8x16xf32, #tpu.memory_space<vmem>>, %arg2: memref<8x16xf32, #tpu.memory_space<vmem>>, %arg3: memref<8x8xi8, #tpu.memory_space<vmem>>, %arg4: memref<2x16x32xbf16, #tpu.memory_space<vmem>>, %arg5: memref<2x1x32xf32, #tpu.memory_space<vmem>>, %arg6: memref<2x1x32xf32, #tpu.memory_space<vmem>>, %arg7: memref<1x32xf32, #tpu.memory_space<vmem>>, %arg8: memref<8x32xf32, #tpu.memory_space<vmem>>) attributes {dimension_semantics = [#tpu.dimension_semantics<parallel>], iteration_bounds = array<i64: 1>, scalar_prefetch = 0 : i64, scratch_operands = 0 : i64, tpu.core_type = #tpu.core_type<tc>, window_params = [{pipeline_mode = #tpu.pipeline_mode<synchronous>, transform_indices = @transform_0, window_bounds = array<i64: 8, 16>}, {transform_indices = @transform_1, window_bounds = array<i64: 8, 16>}, {transform_indices = @transform_2, window_bounds = array<i64: 8, 8>}, {pipeline_mode = #tpu.pipeline_mode<synchronous>, transform_indices = @transform_3, window_bounds = array<i64: 2, 16, 32>}, {pipeline_mode = #tpu.pipeline_mode<synchronous>, transform_indices = @transform_4, window_bounds = array<i64: 2, 1, 32>}, {pipeline_mode = #tpu.pipeline_mode<synchronous>, transform_indices = @transform_5, window_bounds = array<i64: 2, 1, 32>}, {pipeline_mode = #tpu.pipeline_mode<synchronous>, transform_indices = @transform_6, window_bounds = array<i64: 1, 32>}, {transform_indices = @transform_7, window_bounds = array<i64: 8, 32>}]} {
    %c0 = arith.constant 0 : index
    %c0_0 = arith.constant 0 : index
    %0 = vector.load %arg3[%c0, %c0_0] : memref<8x8xi8, #tpu.memory_space<vmem>>, vector<8x8xi8>
    %1 = arith.sitofp %0 : vector<8x8xi8> to vector<8x8xf32>
    %cst = arith.constant 0.000000e+00 : f32
    %2 = vector.broadcast %cst : f32 to vector<8x8xf32>
    %3 = arith.cmpf ogt, %1, %2 : vector<8x8xf32>
    %cst_1 = arith.constant 0.000000e+00 : f32
    %cst_2 = arith.constant -1.000000e+30 : f32
    %4 = vector.broadcast %cst_1 : f32 to vector<8x8xf32>
    %5 = vector.broadcast %cst_2 : f32 to vector<8x8xf32>
    %6 = arith.select %3, %4, %5 : vector<8x8xi1>, vector<8x8xf32>
    %c0_3 = arith.constant 0 : index
    %c0_4 = arith.constant 0 : index
    %c0_5 = arith.constant 0 : index
    %7 = vector.load %arg4[%c0_3, %c0_4, %c0_5] : memref<2x16x32xbf16, #tpu.memory_space<vmem>>, vector<2x16x32xbf16>
    %c0_6 = arith.constant 0 : index
    %c0_7 = arith.constant 0 : index
    %8 = vector.load %arg1[%c0_6, %c0_7] : memref<8x16xf32, #tpu.memory_space<vmem>>, vector<8x16xf32>
    %9 = arith.truncf %8 : vector<8x16xf32> to vector<8x16xbf16>
    %10 = vector.shape_cast %9 : vector<8x16xbf16> to vector<1x8x16xbf16>
    %11 = vector.broadcast %10 : vector<1x8x16xbf16> to vector<2x8x16xbf16>
    %c0_8 = arith.constant 0 : index
    %c0_9 = arith.constant 0 : index
    %12 = vector.load %arg2[%c0_8, %c0_9] : memref<8x16xf32, #tpu.memory_space<vmem>>, vector<8x16xf32>
    %13 = arith.truncf %12 : vector<8x16xf32> to vector<8x16xbf16>
    %14 = vector.shape_cast %13 : vector<8x16xbf16> to vector<1x8x16xbf16>
    %15 = vector.broadcast %14 : vector<1x8x16xbf16> to vector<2x8x16xbf16>
    "tpu.trace_start"() <{level = 10 : i32, message = "hnd,hde->hne"}> : () -> ()
    %cst_10 = arith.constant dense<0.000000e+00> : vector<2x8x32xf32>
    %16 = tpu.matmul %11, %7, %cst_10 {dimension_numbers = #tpu.dot_dimension_numbers<[2], [1], [1], [2], [0, 0, 0, 1, 1, 2], [0], [0]>} : vector<2x8x16xbf16>, vector<2x16x32xbf16>, vector<2x8x32xf32> -> vector<2x8x32xf32>
    %cst_11 = arith.constant dense<0.000000e+00> : vector<2x8x32xf32>
    %17 = tpu.matmul %15, %7, %cst_11 {dimension_numbers = #tpu.dot_dimension_numbers<[2], [1], [1], [2], [0, 0, 0, 1, 1, 2], [0], [0]>} : vector<2x8x16xbf16>, vector<2x16x32xbf16>, vector<2x8x32xf32> -> vector<2x8x32xf32>
    "tpu.trace_stop"() : () -> ()
    %c0_12 = arith.constant 0 : index
    %c0_13 = arith.constant 0 : index
    %c0_14 = arith.constant 0 : index
    %18 = vector.load %arg6[%c0_12, %c0_13, %c0_14] : memref<2x1x32xf32, #tpu.memory_space<vmem>>, vector<2x1x32xf32>
    %19 = vector.broadcast %18 : vector<2x1x32xf32> to vector<2x8x32xf32>
    %20 = arith.mulf %17, %19 : vector<2x8x32xf32>
    %cst_15 = arith.constant dense<0.000000e+00> : vector<2x8xf32>
    %21 = vector.multi_reduction <add>, %20, %cst_15 [2] : vector<2x8x32xf32> to vector<2x8xf32>
    %22 = vector.shape_cast %21 : vector<2x8xf32> to vector<2x8x1xf32>
    %c0_16 = arith.constant 0 : index
    %c0_17 = arith.constant 0 : index
    %c0_18 = arith.constant 0 : index
    %23 = vector.load %arg5[%c0_16, %c0_17, %c0_18] : memref<2x1x32xf32, #tpu.memory_space<vmem>>, vector<2x1x32xf32>
    %24 = vector.broadcast %23 : vector<2x1x32xf32> to vector<2x8x32xf32>
    %25 = arith.mulf %16, %24 : vector<2x8x32xf32>
    %cst_19 = arith.constant dense<0.000000e+00> : vector<2x8xf32>
    %26 = vector.multi_reduction <add>, %25, %cst_19 [2] : vector<2x8x32xf32> to vector<2x8xf32>
    %27 = vector.shape_cast %26 : vector<2x8xf32> to vector<2x1x8xf32>
    %28 = vector.broadcast %22 : vector<2x8x1xf32> to vector<2x8x8xf32>
    %29 = vector.broadcast %27 : vector<2x1x8xf32> to vector<2x8x8xf32>
    %30 = arith.addf %28, %29 : vector<2x8x8xf32>
    %cst_20 = arith.constant 0.000000e+00 : f32
    %31 = vector.broadcast %cst_20 : f32 to vector<2x8x8xf32>
    %32 = arith.cmpf ogt, %30, %31 : vector<2x8x8xf32>
    %cst_21 = arith.constant 2.000000e-01 : f32
    %33 = vector.broadcast %cst_21 : f32 to vector<2x8x8xf32>
    %34 = arith.mulf %33, %30 : vector<2x8x8xf32>
    %35 = arith.select %32, %30, %34 : vector<2x8x8xi1>, vector<2x8x8xf32>
    %36 = vector.shape_cast %6 : vector<8x8xf32> to vector<1x8x8xf32>
    %37 = vector.broadcast %36 : vector<1x8x8xf32> to vector<2x8x8xf32>
    %38 = arith.addf %35, %37 : vector<2x8x8xf32>
    %cst_22 = arith.constant dense<0xFF800000> : vector<2x8xf32>
    %39 = vector.multi_reduction <maximumf>, %38, %cst_22 [2] : vector<2x8x8xf32> to vector<2x8xf32>
    %40 = vector.shape_cast %39 : vector<2x8xf32> to vector<2x8x1xf32>
    %41 = vector.broadcast %40 : vector<2x8x1xf32> to vector<2x8x8xf32>
    %42 = arith.subf %38, %41 : vector<2x8x8xf32>
    %43 = math.exp %42 : vector<2x8x8xf32>
    %cst_23 = arith.constant dense<0.000000e+00> : vector<2x8xf32>
    %44 = vector.multi_reduction <add>, %43, %cst_23 [2] : vector<2x8x8xf32> to vector<2x8xf32>
    %45 = vector.shape_cast %44 : vector<2x8xf32> to vector<2x8x1xf32>
    %46 = tpu.reciprocal %45 {approx = true} : vector<2x8x1xf32> -> vector<2x8x1xf32>
    %47 = vector.broadcast %46 : vector<2x8x1xf32> to vector<2x8x8xf32>
    %48 = arith.mulf %43, %47 : vector<2x8x8xf32>
    %49 = arith.truncf %48 : vector<2x8x8xf32> to vector<2x8x8xbf16>
    %50 = arith.truncf %16 : vector<2x8x32xf32> to vector<2x8x32xbf16>
    "tpu.trace_start"() <{level = 10 : i32, message = "htn,hnd->htd"}> : () -> ()
    %cst_24 = arith.constant dense<0.000000e+00> : vector<2x8x32xf32>
    %51 = tpu.matmul %49, %50, %cst_24 {dimension_numbers = #tpu.dot_dimension_numbers<[2], [1], [1], [2], [0, 0, 0, 1, 1, 2], [0], [0]>} : vector<2x8x8xbf16>, vector<2x8x32xbf16>, vector<2x8x32xf32> -> vector<2x8x32xf32>
    "tpu.trace_stop"() : () -> ()
    %52 = vector.extract_strided_slice %51 {offsets = [0, 0, 0], sizes = [1, 8, 32], strides = [1, 1, 1]} : vector<2x8x32xf32> to vector<1x8x32xf32>
    %53 = vector.shape_cast %52 : vector<1x8x32xf32> to vector<8x32xf32>
    %54 = vector.extract_strided_slice %51 {offsets = [1, 0, 0], sizes = [1, 8, 32], strides = [1, 1, 1]} : vector<2x8x32xf32> to vector<1x8x32xf32>
    %55 = vector.shape_cast %54 : vector<1x8x32xf32> to vector<8x32xf32>
    %56 = arith.addf %53, %55 : vector<8x32xf32>
    %cst_25 = arith.constant 5.000000e-01 : f32
    %57 = vector.broadcast %cst_25 : f32 to vector<8x32xf32>
    %58 = arith.mulf %56, %57 : vector<8x32xf32>
    %c0_26 = arith.constant 0 : index
    %c0_27 = arith.constant 0 : index
    %59 = vector.load %arg7[%c0_26, %c0_27] : memref<1x32xf32, #tpu.memory_space<vmem>>, vector<1x32xf32>
    %60 = vector.broadcast %59 : vector<1x32xf32> to vector<8x32xf32>
    %61 = arith.addf %58, %60 : vector<8x32xf32>
    %c0_28 = arith.constant 0 : index
    %c0_29 = arith.constant 0 : index
    %62 = vector.load %arg8[%c0_28, %c0_29] : memref<8x32xf32, #tpu.memory_space<vmem>>, vector<8x32xf32>
    tpu.vector_store %arg8[%c0_28, %c0_29], %61 {strides = array<i32>} : memref<8x32xf32, #tpu.memory_space<vmem>>, vector<8x32xf32>,
    return
  }
  func.func @transform_0(%arg0: i32) -> (i32, i32) {
    %c0_i32 = arith.constant 0 : i32
    %c0_i32_0 = arith.constant 0 : i32
    %c0_i32_1 = arith.constant 0 : i32
    return %c0_i32, %c0_i32_0 : i32, i32
  }
  func.func @transform_1(%arg0: i32) -> (i32, i32) {
    %c0_i32 = arith.constant 0 : i32
    %c0_i32_0 = arith.constant 0 : i32
    return %arg0, %c0_i32 : i32, i32
  }
  func.func @transform_2(%arg0: i32) -> (i32, i32) {
    %c0_i32 = arith.constant 0 : i32
    %c0_i32_0 = arith.constant 0 : i32
    return %arg0, %c0_i32 : i32, i32
  }
  func.func @transform_3(%arg0: i32) -> (i32, i32, i32) {
    %c0_i32 = arith.constant 0 : i32
    %c0_i32_0 = arith.constant 0 : i32
    %c0_i32_1 = arith.constant 0 : i32
    %c0_i32_2 = arith.constant 0 : i32
    return %c0_i32, %c0_i32_0, %c0_i32_1 : i32, i32, i32
  }
  func.func @transform_4(%arg0: i32) -> (i32, i32, i32) {
    %c0_i32 = arith.constant 0 : i32
    %c0_i32_0 = arith.constant 0 : i32
    %c0_i32_1 = arith.constant 0 : i32
    %c0_i32_2 = arith.constant 0 : i32
    return %c0_i32, %c0_i32_0, %c0_i32_1 : i32, i32, i32
  }
  func.func @transform_5(%arg0: i32) -> (i32, i32, i32) {
    %c0_i32 = arith.constant 0 : i32
    %c0_i32_0 = arith.constant 0 : i32
    %c0_i32_1 = arith.constant 0 : i32
    %c0_i32_2 = arith.constant 0 : i32
    return %c0_i32, %c0_i32_0, %c0_i32_1 : i32, i32, i32
  }
  func.func @transform_6(%arg0: i32) -> (i32, i32) {
    %c0_i32 = arith.constant 0 : i32
    %c0_i32_0 = arith.constant 0 : i32
    %c0_i32_1 = arith.constant 0 : i32
    return %c0_i32, %c0_i32_0 : i32, i32
  }
  func.func @transform_7(%arg0: i32) -> (i32, i32) {
    %c0_i32 = arith.constant 0 : i32
    %c0_i32_0 = arith.constant 0 : i32
    return %arg0, %c0_i32 : i32, i32
  }
}

module attributes {stable_mosaic.version = 11 : i64} {
  func.func @_gpt_combine_kernel(%arg0: i32, %arg1: i32, %arg2: memref<1x4x32xf32, #tpu.memory_space<vmem>>, %arg3: memref<4x32xf32, #tpu.memory_space<vmem>>, %arg4: memref<4x4xf32, #tpu.memory_space<vmem>>, %arg5: memref<1x1x32xf32, #tpu.memory_space<vmem>>, %arg6: memref<1x1x32xf32, #tpu.memory_space<vmem>>, %arg7: memref<1x6x32x16xbf16, #tpu.memory_space<vmem>>, %arg8: memref<1x6x1x16xf32, #tpu.memory_space<vmem>>, %arg9: memref<1x2x16x32xbf16, #tpu.memory_space<vmem>>, %arg10: memref<1x1x32xf32, #tpu.memory_space<vmem>>, %arg11: memref<1x1x32xf32, #tpu.memory_space<vmem>>, %arg12: memref<1x1x32xf32, #tpu.memory_space<vmem>>, %arg13: memref<1x32x128xbf16, #tpu.memory_space<vmem>>, %arg14: memref<1x1x128xf32, #tpu.memory_space<vmem>>, %arg15: memref<1x128x32xbf16, #tpu.memory_space<vmem>>, %arg16: memref<1x1x32xf32, #tpu.memory_space<vmem>>, %arg17: memref<1x32xf32, #tpu.memory_space<vmem>>, %arg18: memref<1x32xf32, #tpu.memory_space<vmem>>, %arg19: memref<32x32xbf16, #tpu.memory_space<vmem>>, %arg20: memref<32x32xbf16, #tpu.memory_space<vmem>>, %arg21: memref<1x32xf32, #tpu.memory_space<vmem>>, %arg22: memref<1x4x32xf32, #tpu.memory_space<vmem>>, %arg23: memref<4x32xf32, #tpu.memory_space<vmem>>) attributes {dimension_semantics = [#tpu.dimension_semantics<parallel>, #tpu.dimension_semantics<arbitrary>], iteration_bounds = array<i64: 2, 2>, scalar_prefetch = 0 : i64, scratch_operands = 1 : i64, tpu.core_type = #tpu.core_type<tc>, window_params = [{transform_indices = @transform_0, window_bounds = array<i64: 1, 4, 32>}, {pipeline_mode = #tpu.pipeline_mode<synchronous>, transform_indices = @transform_1, window_bounds = array<i64: 4, 32>}, {pipeline_mode = #tpu.pipeline_mode<synchronous>, transform_indices = @transform_2, window_bounds = array<i64: 4, 4>}, {transform_indices = @transform_3, window_bounds = array<i64: 1, 1, 32>}, {transform_indices = @transform_4, window_bounds = array<i64: 1, 1, 32>}, {transform_indices = @transform_5, window_bounds = array<i64: 1, 6, 32, 16>}, {transform_indices = @transform_6, window_bounds = array<i64: 1, 6, 1, 16>}, {transform_indices = @transform_7, window_bounds = array<i64: 1, 2, 16, 32>}, {transform_indices = @transform_8, window_bounds = array<i64: 1, 1, 32>}, {transform_indices = @transform_9, window_bounds = array<i64: 1, 1, 32>}, {transform_indices = @transform_10, window_bounds = array<i64: 1, 1, 32>}, {transform_indices = @transform_11, window_bounds = array<i64: 1, 32, 128>}, {transform_indices = @transform_12, window_bounds = array<i64: 1, 1, 128>}, {transform_indices = @transform_13, window_bounds = array<i64: 1, 128, 32>}, {transform_indices = @transform_14, window_bounds = array<i64: 1, 1, 32>}, {pipeline_mode = #tpu.pipeline_mode<synchronous>, transform_indices = @transform_15, window_bounds = array<i64: 1, 32>}, {pipeline_mode = #tpu.pipeline_mode<synchronous>, transform_indices = @transform_16, window_bounds = array<i64: 1, 32>}, {pipeline_mode = #tpu.pipeline_mode<synchronous>, transform_indices = @transform_17, window_bounds = array<i64: 32, 32>}, {pipeline_mode = #tpu.pipeline_mode<synchronous>, transform_indices = @transform_18, window_bounds = array<i64: 32, 32>}, {pipeline_mode = #tpu.pipeline_mode<synchronous>, transform_indices = @transform_19, window_bounds = array<i64: 1, 32>}, {transform_indices = @transform_20, window_bounds = array<i64: 1, 4, 32>}]} {
    %c0_i32 = arith.constant 0 : i32
    %0 = arith.cmpi eq, %arg1, %c0_i32 : i32
    %1 = arith.extui %0 : i1 to i32
    %c0_i32_0 = arith.constant 0 : i32
    %2 = arith.cmpi ne, %1, %c0_i32_0 : i32
    scf.if %2 {
      %c0_68 = arith.constant 0 : index
      %c0_69 = arith.constant 0 : index
      %c0_70 = arith.constant 0 : index
      %139 = vector.load %arg2[%c0_68, %c0_69, %c0_70] : memref<1x4x32xf32, #tpu.memory_space<vmem>>, vector<1x4x32xf32>
      %140 = vector.shape_cast %139 : vector<1x4x32xf32> to vector<4x32xf32>
      %c0_71 = arith.constant 0 : index
      %c0_72 = arith.constant 0 : index
      %141 = vector.load %arg3[%c0_71, %c0_72] : memref<4x32xf32, #tpu.memory_space<vmem>>, vector<4x32xf32>
      %142 = arith.addf %140, %141 : vector<4x32xf32>
      %c0_73 = arith.constant 0 : index
      %c0_74 = arith.constant 0 : index
      %143 = vector.load %arg23[%c0_73, %c0_74] : memref<4x32xf32, #tpu.memory_space<vmem>>, vector<4x32xf32>
      tpu.vector_store %arg23[%c0_73, %c0_74], %142 {strides = array<i32>} : memref<4x32xf32, #tpu.memory_space<vmem>>, vector<4x32xf32>,
    } else {
    }
    %c0 = arith.constant 0 : index
    %c0_1 = arith.constant 0 : index
    %3 = vector.load %arg23[%c0, %c0_1] : memref<4x32xf32, #tpu.memory_space<vmem>>, vector<4x32xf32>
    %c0_2 = arith.constant 0 : index
    %c0_3 = arith.constant 0 : index
    %c0_4 = arith.constant 0 : index
    %4 = vector.load %arg5[%c0_2, %c0_3, %c0_4] : memref<1x1x32xf32, #tpu.memory_space<vmem>>, vector<1x1x32xf32>
    %5 = vector.shape_cast %4 : vector<1x1x32xf32> to vector<1x32xf32>
    %c0_5 = arith.constant 0 : index
    %c0_6 = arith.constant 0 : index
    %c0_7 = arith.constant 0 : index
    %6 = vector.load %arg6[%c0_5, %c0_6, %c0_7] : memref<1x1x32xf32, #tpu.memory_space<vmem>>, vector<1x1x32xf32>
    %7 = vector.shape_cast %6 : vector<1x1x32xf32> to vector<1x32xf32>
    %cst = arith.constant dense<0.000000e+00> : vector<4xf32>
    %8 = vector.multi_reduction <add>, %3, %cst [1] : vector<4x32xf32> to vector<4xf32>
    %9 = vector.shape_cast %8 : vector<4xf32> to vector<4x1xf32>
    %cst_8 = arith.constant 3.200000e+01 : f32
    %10 = vector.broadcast %cst_8 : f32 to vector<4x1xf32>
    %11 = arith.divf %9, %10 : vector<4x1xf32>
    %12 = vector.broadcast %11 : vector<4x1xf32> to vector<4x32xf32>
    %13 = arith.subf %3, %12 : vector<4x32xf32>
    %14 = arith.mulf %13, %13 : vector<4x32xf32>
    %cst_9 = arith.constant dense<0.000000e+00> : vector<4xf32>
    %15 = vector.multi_reduction <add>, %14, %cst_9 [1] : vector<4x32xf32> to vector<4xf32>
    %16 = vector.shape_cast %15 : vector<4xf32> to vector<4x1xf32>
    %cst_10 = arith.constant 3.200000e+01 : f32
    %17 = vector.broadcast %cst_10 : f32 to vector<4x1xf32>
    %18 = arith.divf %16, %17 : vector<4x1xf32>
    %19 = vector.broadcast %11 : vector<4x1xf32> to vector<4x32xf32>
    %20 = arith.subf %3, %19 : vector<4x32xf32>
    %cst_11 = arith.constant 9.99999974E-6 : f32
    %21 = vector.broadcast %cst_11 : f32 to vector<4x1xf32>
    %22 = arith.addf %18, %21 : vector<4x1xf32>
    %23 = math.rsqrt %22 : vector<4x1xf32>
    %24 = vector.broadcast %23 : vector<4x1xf32> to vector<4x32xf32>
    %25 = arith.mulf %20, %24 : vector<4x32xf32>
    %26 = vector.broadcast %5 : vector<1x32xf32> to vector<4x32xf32>
    %27 = arith.mulf %25, %26 : vector<4x32xf32>
    %28 = vector.broadcast %7 : vector<1x32xf32> to vector<4x32xf32>
    %29 = arith.addf %27, %28 : vector<4x32xf32>
    %30 = arith.truncf %29 : vector<4x32xf32> to vector<4x32xbf16>
    %31 = vector.shape_cast %30 : vector<4x32xbf16> to vector<1x4x32xbf16>
    %32 = vector.broadcast %31 : vector<1x4x32xbf16> to vector<6x4x32xbf16>
    %c0_12 = arith.constant 0 : index
    %c0_13 = arith.constant 0 : index
    %c0_14 = arith.constant 0 : index
    %c0_15 = arith.constant 0 : index
    %33 = vector.load %arg7[%c0_12, %c0_13, %c0_14, %c0_15] : memref<1x6x32x16xbf16, #tpu.memory_space<vmem>>, vector<1x6x32x16xbf16>
    %34 = vector.shape_cast %33 : vector<1x6x32x16xbf16> to vector<6x32x16xbf16>
    "tpu.trace_start"() <{level = 10 : i32, message = "bsh,bhe->bse"}> : () -> ()
    %cst_16 = arith.constant dense<0.000000e+00> : vector<6x4x16xf32>
    %35 = tpu.matmul %32, %34, %cst_16 {dimension_numbers = #tpu.dot_dimension_numbers<[2], [1], [1], [2], [0, 0, 0, 1, 1, 2], [0], [0]>} : vector<6x4x32xbf16>, vector<6x32x16xbf16>, vector<6x4x16xf32> -> vector<6x4x16xf32>
    "tpu.trace_stop"() : () -> ()
    %c0_17 = arith.constant 0 : index
    %c0_18 = arith.constant 0 : index
    %c0_19 = arith.constant 0 : index
    %c0_20 = arith.constant 0 : index
    %36 = vector.load %arg8[%c0_17, %c0_18, %c0_19, %c0_20] : memref<1x6x1x16xf32, #tpu.memory_space<vmem>>, vector<1x6x1x16xf32>
    %37 = vector.shape_cast %36 : vector<1x6x1x16xf32> to vector<6x1x16xf32>
    %38 = vector.broadcast %37 : vector<6x1x16xf32> to vector<6x4x16xf32>
    %39 = arith.addf %35, %38 : vector<6x4x16xf32>
    %40 = vector.extract_strided_slice %39 {offsets = [0, 0, 0], sizes = [2, 4, 16], strides = [1, 1, 1]} : vector<6x4x16xf32> to vector<2x4x16xf32>
    %cst_21 = arith.constant 2.500000e-01 : f32
    %41 = vector.broadcast %cst_21 : f32 to vector<2x4x16xf32>
    %42 = arith.mulf %40, %41 : vector<2x4x16xf32>
    %43 = vector.extract_strided_slice %39 {offsets = [2, 0, 0], sizes = [2, 4, 16], strides = [1, 1, 1]} : vector<6x4x16xf32> to vector<2x4x16xf32>
    %44 = vector.extract_strided_slice %39 {offsets = [4, 0, 0], sizes = [2, 4, 16], strides = [1, 1, 1]} : vector<6x4x16xf32> to vector<2x4x16xf32>
    %45 = arith.truncf %42 : vector<2x4x16xf32> to vector<2x4x16xbf16>
    %46 = arith.truncf %43 : vector<2x4x16xf32> to vector<2x4x16xbf16>
    "tpu.trace_start"() <{level = 10 : i32, message = "hqd,hkd->hqk"}> : () -> ()
    %cst_22 = arith.constant dense<0.000000e+00> : vector<2x4x4xf32>
    %47 = tpu.matmul %45, %46, %cst_22 {dimension_numbers = #tpu.dot_dimension_numbers<[2], [2], [1], [1], [0, 0, 0, 1, 1, 1], [0], [0]>} : vector<2x4x16xbf16>, vector<2x4x16xbf16>, vector<2x4x4xf32> -> vector<2x4x4xf32>
    "tpu.trace_stop"() : () -> ()
    %c0_23 = arith.constant 0 : index
    %c0_24 = arith.constant 0 : index
    %48 = vector.load %arg4[%c0_23, %c0_24] : memref<4x4xf32, #tpu.memory_space<vmem>>, vector<4x4xf32>
    %49 = vector.shape_cast %48 : vector<4x4xf32> to vector<1x4x4xf32>
    %50 = vector.broadcast %49 : vector<1x4x4xf32> to vector<2x4x4xf32>
    %51 = arith.addf %47, %50 : vector<2x4x4xf32>
    %cst_25 = arith.constant dense<0xFF800000> : vector<2x4xf32>
    %52 = vector.multi_reduction <maximumf>, %51, %cst_25 [2] : vector<2x4x4xf32> to vector<2x4xf32>
    %53 = vector.shape_cast %52 : vector<2x4xf32> to vector<2x4x1xf32>
    %54 = vector.broadcast %53 : vector<2x4x1xf32> to vector<2x4x4xf32>
    %55 = arith.subf %51, %54 : vector<2x4x4xf32>
    %56 = math.exp %55 : vector<2x4x4xf32>
    %cst_26 = arith.constant dense<0.000000e+00> : vector<2x4xf32>
    %57 = vector.multi_reduction <add>, %56, %cst_26 [2] : vector<2x4x4xf32> to vector<2x4xf32>
    %58 = vector.shape_cast %57 : vector<2x4xf32> to vector<2x4x1xf32>
    %59 = tpu.reciprocal %58 {approx = true} : vector<2x4x1xf32> -> vector<2x4x1xf32>
    %60 = vector.broadcast %59 : vector<2x4x1xf32> to vector<2x4x4xf32>
    %61 = arith.mulf %56, %60 : vector<2x4x4xf32>
    %62 = arith.truncf %61 : vector<2x4x4xf32> to vector<2x4x4xbf16>
    %63 = arith.truncf %44 : vector<2x4x16xf32> to vector<2x4x16xbf16>
    "tpu.trace_start"() <{level = 10 : i32, message = "hqk,hkd->hqd"}> : () -> ()
    %cst_27 = arith.constant dense<0.000000e+00> : vector<2x4x16xf32>
    %64 = tpu.matmul %62, %63, %cst_27 {dimension_numbers = #tpu.dot_dimension_numbers<[2], [1], [1], [2], [0, 0, 0, 1, 1, 2], [0], [0]>} : vector<2x4x4xbf16>, vector<2x4x16xbf16>, vector<2x4x16xf32> -> vector<2x4x16xf32>
    "tpu.trace_stop"() : () -> ()
    %65 = arith.truncf %64 : vector<2x4x16xf32> to vector<2x4x16xbf16>
    %c0_28 = arith.constant 0 : index
    %c0_29 = arith.constant 0 : index
    %c0_30 = arith.constant 0 : index
    %c0_31 = arith.constant 0 : index
    %66 = vector.load %arg9[%c0_28, %c0_29, %c0_30, %c0_31] : memref<1x2x16x32xbf16, #tpu.memory_space<vmem>>, vector<1x2x16x32xbf16>
    %67 = vector.shape_cast %66 : vector<1x2x16x32xbf16> to vector<2x16x32xbf16>
    "tpu.trace_start"() <{level = 10 : i32, message = "hsd,hde->hse"}> : () -> ()
    %cst_32 = arith.constant dense<0.000000e+00> : vector<2x4x32xf32>
    %68 = tpu.matmul %65, %67, %cst_32 {dimension_numbers = #tpu.dot_dimension_numbers<[2], [1], [1], [2], [0, 0, 0, 1, 1, 2], [0], [0]>} : vector<2x4x16xbf16>, vector<2x16x32xbf16>, vector<2x4x32xf32> -> vector<2x4x32xf32>
    "tpu.trace_stop"() : () -> ()
    %69 = vector.extract_strided_slice %68 {offsets = [0, 0, 0], sizes = [1, 4, 32], strides = [1, 1, 1]} : vector<2x4x32xf32> to vector<1x4x32xf32>
    %70 = vector.shape_cast %69 : vector<1x4x32xf32> to vector<4x32xf32>
    %71 = vector.extract_strided_slice %68 {offsets = [1, 0, 0], sizes = [1, 4, 32], strides = [1, 1, 1]} : vector<2x4x32xf32> to vector<1x4x32xf32>
    %72 = vector.shape_cast %71 : vector<1x4x32xf32> to vector<4x32xf32>
    %73 = arith.addf %70, %72 : vector<4x32xf32>
    %74 = arith.addf %3, %73 : vector<4x32xf32>
    %c0_33 = arith.constant 0 : index
    %c0_34 = arith.constant 0 : index
    %c0_35 = arith.constant 0 : index
    %75 = vector.load %arg10[%c0_33, %c0_34, %c0_35] : memref<1x1x32xf32, #tpu.memory_space<vmem>>, vector<1x1x32xf32>
    %76 = vector.shape_cast %75 : vector<1x1x32xf32> to vector<1x32xf32>
    %77 = vector.broadcast %76 : vector<1x32xf32> to vector<4x32xf32>
    %78 = arith.addf %74, %77 : vector<4x32xf32>
    %c0_36 = arith.constant 0 : index
    %c0_37 = arith.constant 0 : index
    %c0_38 = arith.constant 0 : index
    %79 = vector.load %arg11[%c0_36, %c0_37, %c0_38] : memref<1x1x32xf32, #tpu.memory_space<vmem>>, vector<1x1x32xf32>
    %80 = vector.shape_cast %79 : vector<1x1x32xf32> to vector<1x32xf32>
    %c0_39 = arith.constant 0 : index
    %c0_40 = arith.constant 0 : index
    %c0_41 = arith.constant 0 : index
    %81 = vector.load %arg12[%c0_39, %c0_40, %c0_41] : memref<1x1x32xf32, #tpu.memory_space<vmem>>, vector<1x1x32xf32>
    %82 = vector.shape_cast %81 : vector<1x1x32xf32> to vector<1x32xf32>
    %cst_42 = arith.constant dense<0.000000e+00> : vector<4xf32>
    %83 = vector.multi_reduction <add>, %78, %cst_42 [1] : vector<4x32xf32> to vector<4xf32>
    %84 = vector.shape_cast %83 : vector<4xf32> to vector<4x1xf32>
    %cst_43 = arith.constant 3.200000e+01 : f32
    %85 = vector.broadcast %cst_43 : f32 to vector<4x1xf32>
    %86 = arith.divf %84, %85 : vector<4x1xf32>
    %87 = vector.broadcast %86 : vector<4x1xf32> to vector<4x32xf32>
    %88 = arith.subf %78, %87 : vector<4x32xf32>
    %89 = arith.mulf %88, %88 : vector<4x32xf32>
    %cst_44 = arith.constant dense<0.000000e+00> : vector<4xf32>
    %90 = vector.multi_reduction <add>, %89, %cst_44 [1] : vector<4x32xf32> to vector<4xf32>
    %91 = vector.shape_cast %90 : vector<4xf32> to vector<4x1xf32>
    %cst_45 = arith.constant 3.200000e+01 : f32
    %92 = vector.broadcast %cst_45 : f32 to vector<4x1xf32>
    %93 = arith.divf %91, %92 : vector<4x1xf32>
    %94 = vector.broadcast %86 : vector<4x1xf32> to vector<4x32xf32>
    %95 = arith.subf %78, %94 : vector<4x32xf32>
    %cst_46 = arith.constant 9.99999974E-6 : f32
    %96 = vector.broadcast %cst_46 : f32 to vector<4x1xf32>
    %97 = arith.addf %93, %96 : vector<4x1xf32>
    %98 = math.rsqrt %97 : vector<4x1xf32>
    %99 = vector.broadcast %98 : vector<4x1xf32> to vector<4x32xf32>
    %100 = arith.mulf %95, %99 : vector<4x32xf32>
    %101 = vector.broadcast %80 : vector<1x32xf32> to vector<4x32xf32>
    %102 = arith.mulf %100, %101 : vector<4x32xf32>
    %103 = vector.broadcast %82 : vector<1x32xf32> to vector<4x32xf32>
    %104 = arith.addf %102, %103 : vector<4x32xf32>
    %105 = arith.truncf %104 : vector<4x32xf32> to vector<4x32xbf16>
    %c0_47 = arith.constant 0 : index
    %c0_48 = arith.constant 0 : index
    %c0_49 = arith.constant 0 : index
    %106 = vector.load %arg13[%c0_47, %c0_48, %c0_49] : memref<1x32x128xbf16, #tpu.memory_space<vmem>>, vector<1x32x128xbf16>
    %107 = vector.shape_cast %106 : vector<1x32x128xbf16> to vector<32x128xbf16>
    %cst_50 = arith.constant dense<0.000000e+00> : vector<4x128xf32>
    %108 = tpu.matmul %105, %107, %cst_50 {dimension_numbers = #tpu.dot_dimension_numbers<[1], [0], [0], [1], [0, 0, 1, 1], [], []>} : vector<4x32xbf16>, vector<32x128xbf16>, vector<4x128xf32> -> vector<4x128xf32>
    %c0_51 = arith.constant 0 : index
    %c0_52 = arith.constant 0 : index
    %c0_53 = arith.constant 0 : index
    %109 = vector.load %arg14[%c0_51, %c0_52, %c0_53] : memref<1x1x128xf32, #tpu.memory_space<vmem>>, vector<1x1x128xf32>
    %110 = vector.shape_cast %109 : vector<1x1x128xf32> to vector<1x128xf32>
    %111 = vector.broadcast %110 : vector<1x128xf32> to vector<4x128xf32>
    %112 = arith.addf %108, %111 : vector<4x128xf32>
    %cst_54 = arith.constant 5.000000e-01 : f32
    %113 = vector.broadcast %cst_54 : f32 to vector<4x128xf32>
    %114 = arith.mulf %113, %112 : vector<4x128xf32>
    %cst_55 = arith.constant 4.471500e-02 : f32
    %115 = vector.broadcast %cst_55 : f32 to vector<4x128xf32>
    %116 = arith.mulf %115, %112 : vector<4x128xf32>
    %117 = arith.mulf %116, %112 : vector<4x128xf32>
    %118 = arith.mulf %117, %112 : vector<4x128xf32>
    %119 = arith.addf %112, %118 : vector<4x128xf32>
    %cst_56 = arith.constant 0.797884583 : f32
    %120 = vector.broadcast %cst_56 : f32 to vector<4x128xf32>
    %121 = arith.mulf %120, %119 : vector<4x128xf32>
    %122 = math.tanh %121 : vector<4x128xf32>
    %cst_57 = arith.constant 1.000000e+00 : f32
    %123 = vector.broadcast %cst_57 : f32 to vector<4x128xf32>
    %124 = arith.addf %123, %122 : vector<4x128xf32>
    %125 = arith.mulf %114, %124 : vector<4x128xf32>
    %126 = arith.truncf %125 : vector<4x128xf32> to vector<4x128xbf16>
    %c0_58 = arith.constant 0 : index
    %c0_59 = arith.constant 0 : index
    %c0_60 = arith.constant 0 : index
    %127 = vector.load %arg15[%c0_58, %c0_59, %c0_60] : memref<1x128x32xbf16, #tpu.memory_space<vmem>>, vector<1x128x32xbf16>
    %128 = vector.shape_cast %127 : vector<1x128x32xbf16> to vector<128x32xbf16>
    %cst_61 = arith.constant dense<0.000000e+00> : vector<4x32xf32>
    %129 = tpu.matmul %126, %128, %cst_61 {dimension_numbers = #tpu.dot_dimension_numbers<[1], [0], [0], [1], [0, 0, 1, 1], [], []>} : vector<4x128xbf16>, vector<128x32xbf16>, vector<4x32xf32> -> vector<4x32xf32>
    %c0_62 = arith.constant 0 : index
    %c0_63 = arith.constant 0 : index
    %c0_64 = arith.constant 0 : index
    %130 = vector.load %arg16[%c0_62, %c0_63, %c0_64] : memref<1x1x32xf32, #tpu.memory_space<vmem>>, vector<1x1x32xf32>
    %131 = vector.shape_cast %130 : vector<1x1x32xf32> to vector<1x32xf32>
    %132 = vector.broadcast %131 : vector<1x32xf32> to vector<4x32xf32>
    %133 = arith.addf %129, %132 : vector<4x32xf32>
    %134 = arith.addf %78, %133 : vector<4x32xf32>
    %c0_65 = arith.constant 0 : index
    %c0_66 = arith.constant 0 : index
    %135 = vector.load %arg23[%c0_65, %c0_66] : memref<4x32xf32, #tpu.memory_space<vmem>>, vector<4x32xf32>
    tpu.vector_store %arg23[%c0_65, %c0_66], %134 {strides = array<i32>} : memref<4x32xf32, #tpu.memory_space<vmem>>, vector<4x32xf32>,
    %c1_i32 = arith.constant 1 : i32
    %136 = arith.cmpi eq, %arg1, %c1_i32 : i32
    %137 = arith.extui %136 : i1 to i32
    %c0_i32_67 = arith.constant 0 : i32
    %138 = arith.cmpi ne, %137, %c0_i32_67 : i32
    scf.if %138 {
      %c0_68 = arith.constant 0 : index
      %c0_69 = arith.constant 0 : index
      %139 = vector.load %arg17[%c0_68, %c0_69] : memref<1x32xf32, #tpu.memory_space<vmem>>, vector<1x32xf32>
      %c0_70 = arith.constant 0 : index
      %c0_71 = arith.constant 0 : index
      %140 = vector.load %arg18[%c0_70, %c0_71] : memref<1x32xf32, #tpu.memory_space<vmem>>, vector<1x32xf32>
      %cst_72 = arith.constant dense<0.000000e+00> : vector<4xf32>
      %141 = vector.multi_reduction <add>, %134, %cst_72 [1] : vector<4x32xf32> to vector<4xf32>
      %142 = vector.shape_cast %141 : vector<4xf32> to vector<4x1xf32>
      %cst_73 = arith.constant 3.200000e+01 : f32
      %143 = vector.broadcast %cst_73 : f32 to vector<4x1xf32>
      %144 = arith.divf %142, %143 : vector<4x1xf32>
      %145 = vector.broadcast %144 : vector<4x1xf32> to vector<4x32xf32>
      %146 = arith.subf %134, %145 : vector<4x32xf32>
      %147 = arith.mulf %146, %146 : vector<4x32xf32>
      %cst_74 = arith.constant dense<0.000000e+00> : vector<4xf32>
      %148 = vector.multi_reduction <add>, %147, %cst_74 [1] : vector<4x32xf32> to vector<4xf32>
      %149 = vector.shape_cast %148 : vector<4xf32> to vector<4x1xf32>
      %cst_75 = arith.constant 3.200000e+01 : f32
      %150 = vector.broadcast %cst_75 : f32 to vector<4x1xf32>
      %151 = arith.divf %149, %150 : vector<4x1xf32>
      %152 = vector.broadcast %144 : vector<4x1xf32> to vector<4x32xf32>
      %153 = arith.subf %134, %152 : vector<4x32xf32>
      %cst_76 = arith.constant 9.99999974E-6 : f32
      %154 = vector.broadcast %cst_76 : f32 to vector<4x1xf32>
      %155 = arith.addf %151, %154 : vector<4x1xf32>
      %156 = math.rsqrt %155 : vector<4x1xf32>
      %157 = vector.broadcast %156 : vector<4x1xf32> to vector<4x32xf32>
      %158 = arith.mulf %153, %157 : vector<4x32xf32>
      %159 = vector.broadcast %139 : vector<1x32xf32> to vector<4x32xf32>
      %160 = arith.mulf %158, %159 : vector<4x32xf32>
      %161 = vector.broadcast %140 : vector<1x32xf32> to vector<4x32xf32>
      %162 = arith.addf %160, %161 : vector<4x32xf32>
      %c0_77 = arith.constant 0 : index
      %c0_78 = arith.constant 0 : index
      %c0_79 = arith.constant 0 : index
      %163 = vector.load %arg2[%c0_77, %c0_78, %c0_79] : memref<1x4x32xf32, #tpu.memory_space<vmem>>, vector<1x4x32xf32>
      %164 = vector.shape_cast %163 : vector<1x4x32xf32> to vector<4x32xf32>
      %165 = arith.truncf %164 : vector<4x32xf32> to vector<4x32xbf16>
      %c0_80 = arith.constant 0 : index
      %c0_81 = arith.constant 0 : index
      %166 = vector.load %arg19[%c0_80, %c0_81] : memref<32x32xbf16, #tpu.memory_space<vmem>>, vector<32x32xbf16>
      %cst_82 = arith.constant dense<0.000000e+00> : vector<4x32xf32>
      %167 = tpu.matmul %165, %166, %cst_82 {dimension_numbers = #tpu.dot_dimension_numbers<[1], [0], [0], [1], [0, 0, 1, 1], [], []>} : vector<4x32xbf16>, vector<32x32xbf16>, vector<4x32xf32> -> vector<4x32xf32>
      %168 = arith.truncf %162 : vector<4x32xf32> to vector<4x32xbf16>
      %c0_83 = arith.constant 0 : index
      %c0_84 = arith.constant 0 : index
      %169 = vector.load %arg20[%c0_83, %c0_84] : memref<32x32xbf16, #tpu.memory_space<vmem>>, vector<32x32xbf16>
      %cst_85 = arith.constant dense<0.000000e+00> : vector<4x32xf32>
      %170 = tpu.matmul %168, %169, %cst_85 {dimension_numbers = #tpu.dot_dimension_numbers<[1], [0], [0], [1], [0, 0, 1, 1], [], []>} : vector<4x32xbf16>, vector<32x32xbf16>, vector<4x32xf32> -> vector<4x32xf32>
      %171 = arith.addf %167, %170 : vector<4x32xf32>
      %c0_86 = arith.constant 0 : index
      %c0_87 = arith.constant 0 : index
      %172 = vector.load %arg21[%c0_86, %c0_87] : memref<1x32xf32, #tpu.memory_space<vmem>>, vector<1x32xf32>
      %173 = vector.broadcast %172 : vector<1x32xf32> to vector<4x32xf32>
      %174 = arith.addf %171, %173 : vector<4x32xf32>
      %c0_88 = arith.constant 0 : index
      %c0_89 = arith.constant 0 : index
      %c0_90 = arith.constant 0 : index
      %175 = vector.load %arg22[%c0_88, %c0_89, %c0_90] : memref<1x4x32xf32, #tpu.memory_space<vmem>>, vector<1x4x32xf32>
      %176 = vector.shape_cast %175 : vector<1x4x32xf32> to vector<4x32xf32>
      %177 = vector.shape_cast %174 : vector<4x32xf32> to vector<1x4x32xf32>
      tpu.vector_store %arg22[%c0_88, %c0_89, %c0_90], %177 {strides = array<i32>} : memref<1x4x32xf32, #tpu.memory_space<vmem>>, vector<1x4x32xf32>,
    } else {
    }
    return
  }
  func.func @transform_0(%arg0: i32, %arg1: i32) -> (i32, i32, i32) {
    %c0_i32 = arith.constant 0 : i32
    %c0_i32_0 = arith.constant 0 : i32
    %c0_i32_1 = arith.constant 0 : i32
    return %arg0, %c0_i32, %c0_i32_0 : i32, i32, i32
  }
  func.func @transform_1(%arg0: i32, %arg1: i32) -> (i32, i32) {
    %c0_i32 = arith.constant 0 : i32
    %c0_i32_0 = arith.constant 0 : i32
    %c0_i32_1 = arith.constant 0 : i32
    return %c0_i32, %c0_i32_0 : i32, i32
  }
  func.func @transform_2(%arg0: i32, %arg1: i32) -> (i32, i32) {
    %c0_i32 = arith.constant 0 : i32
    %c0_i32_0 = arith.constant 0 : i32
    %c0_i32_1 = arith.constant 0 : i32
    return %c0_i32, %c0_i32_0 : i32, i32
  }
  func.func @transform_3(%arg0: i32, %arg1: i32) -> (i32, i32, i32) {
    %c0_i32 = arith.constant 0 : i32
    %c0_i32_0 = arith.constant 0 : i32
    %c0_i32_1 = arith.constant 0 : i32
    return %arg1, %c0_i32, %c0_i32_0 : i32, i32, i32
  }
  func.func @transform_4(%arg0: i32, %arg1: i32) -> (i32, i32, i32) {
    %c0_i32 = arith.constant 0 : i32
    %c0_i32_0 = arith.constant 0 : i32
    %c0_i32_1 = arith.constant 0 : i32
    return %arg1, %c0_i32, %c0_i32_0 : i32, i32, i32
  }
  func.func @transform_5(%arg0: i32, %arg1: i32) -> (i32, i32, i32, i32) {
    %c0_i32 = arith.constant 0 : i32
    %c0_i32_0 = arith.constant 0 : i32
    %c0_i32_1 = arith.constant 0 : i32
    %c0_i32_2 = arith.constant 0 : i32
    return %arg1, %c0_i32, %c0_i32_0, %c0_i32_1 : i32, i32, i32, i32
  }
  func.func @transform_6(%arg0: i32, %arg1: i32) -> (i32, i32, i32, i32) {
    %c0_i32 = arith.constant 0 : i32
    %c0_i32_0 = arith.constant 0 : i32
    %c0_i32_1 = arith.constant 0 : i32
    %c0_i32_2 = arith.constant 0 : i32
    return %arg1, %c0_i32, %c0_i32_0, %c0_i32_1 : i32, i32, i32, i32
  }
  func.func @transform_7(%arg0: i32, %arg1: i32) -> (i32, i32, i32, i32) {
    %c0_i32 = arith.constant 0 : i32
    %c0_i32_0 = arith.constant 0 : i32
    %c0_i32_1 = arith.constant 0 : i32
    %c0_i32_2 = arith.constant 0 : i32
    return %arg1, %c0_i32, %c0_i32_0, %c0_i32_1 : i32, i32, i32, i32
  }
  func.func @transform_8(%arg0: i32, %arg1: i32) -> (i32, i32, i32) {
    %c0_i32 = arith.constant 0 : i32
    %c0_i32_0 = arith.constant 0 : i32
    %c0_i32_1 = arith.constant 0 : i32
    return %arg1, %c0_i32, %c0_i32_0 : i32, i32, i32
  }
  func.func @transform_9(%arg0: i32, %arg1: i32) -> (i32, i32, i32) {
    %c0_i32 = arith.constant 0 : i32
    %c0_i32_0 = arith.constant 0 : i32
    %c0_i32_1 = arith.constant 0 : i32
    return %arg1, %c0_i32, %c0_i32_0 : i32, i32, i32
  }
  func.func @transform_10(%arg0: i32, %arg1: i32) -> (i32, i32, i32) {
    %c0_i32 = arith.constant 0 : i32
    %c0_i32_0 = arith.constant 0 : i32
    %c0_i32_1 = arith.constant 0 : i32
    return %arg1, %c0_i32, %c0_i32_0 : i32, i32, i32
  }
  func.func @transform_11(%arg0: i32, %arg1: i32) -> (i32, i32, i32) {
    %c0_i32 = arith.constant 0 : i32
    %c0_i32_0 = arith.constant 0 : i32
    %c0_i32_1 = arith.constant 0 : i32
    return %arg1, %c0_i32, %c0_i32_0 : i32, i32, i32
  }
  func.func @transform_12(%arg0: i32, %arg1: i32) -> (i32, i32, i32) {
    %c0_i32 = arith.constant 0 : i32
    %c0_i32_0 = arith.constant 0 : i32
    %c0_i32_1 = arith.constant 0 : i32
    return %arg1, %c0_i32, %c0_i32_0 : i32, i32, i32
  }
  func.func @transform_13(%arg0: i32, %arg1: i32) -> (i32, i32, i32) {
    %c0_i32 = arith.constant 0 : i32
    %c0_i32_0 = arith.constant 0 : i32
    %c0_i32_1 = arith.constant 0 : i32
    return %arg1, %c0_i32, %c0_i32_0 : i32, i32, i32
  }
  func.func @transform_14(%arg0: i32, %arg1: i32) -> (i32, i32, i32) {
    %c0_i32 = arith.constant 0 : i32
    %c0_i32_0 = arith.constant 0 : i32
    %c0_i32_1 = arith.constant 0 : i32
    return %arg1, %c0_i32, %c0_i32_0 : i32, i32, i32
  }
  func.func @transform_15(%arg0: i32, %arg1: i32) -> (i32, i32) {
    %c0_i32 = arith.constant 0 : i32
    %c0_i32_0 = arith.constant 0 : i32
    %c0_i32_1 = arith.constant 0 : i32
    return %c0_i32, %c0_i32_0 : i32, i32
  }
  func.func @transform_16(%arg0: i32, %arg1: i32) -> (i32, i32) {
    %c0_i32 = arith.constant 0 : i32
    %c0_i32_0 = arith.constant 0 : i32
    %c0_i32_1 = arith.constant 0 : i32
    return %c0_i32, %c0_i32_0 : i32, i32
  }
  func.func @transform_17(%arg0: i32, %arg1: i32) -> (i32, i32) {
    %c0_i32 = arith.constant 0 : i32
    %c0_i32_0 = arith.constant 0 : i32
    %c0_i32_1 = arith.constant 0 : i32
    return %c0_i32, %c0_i32_0 : i32, i32
  }
  func.func @transform_18(%arg0: i32, %arg1: i32) -> (i32, i32) {
    %c0_i32 = arith.constant 0 : i32
    %c0_i32_0 = arith.constant 0 : i32
    %c0_i32_1 = arith.constant 0 : i32
    return %c0_i32, %c0_i32_0 : i32, i32
  }
  func.func @transform_19(%arg0: i32, %arg1: i32) -> (i32, i32) {
    %c0_i32 = arith.constant 0 : i32
    %c0_i32_0 = arith.constant 0 : i32
    %c0_i32_1 = arith.constant 0 : i32
    return %c0_i32, %c0_i32_0 : i32, i32
  }
  func.func @transform_20(%arg0: i32, %arg1: i32) -> (i32, i32, i32) {
    %c0_i32 = arith.constant 0 : i32
    %c0_i32_0 = arith.constant 0 : i32
    %c0_i32_1 = arith.constant 0 : i32
    return %arg0, %c0_i32, %c0_i32_0 : i32, i32, i32
  }
}

</mosaic_0001>

<bundles_post_ra>
// kernel: run.3
= control target key start
LH: loop header
LB: loop body
LE: loop exit
PB: predicated region body
PF: predicated region fallthrough
CT: control target
= control target key end

     0   :  { %v519_v0 = vmov 0.0   ;;  %vm520_vm0 = vmmov 0   ;;  %vm46_vm1 = vcmask 130048   ;;  %vm235_vm2 = vcmask 261120   ;;  %s629_s3 = inlined_call_operand.vmem [shape: bf16[2,16,32], index: 3, kind: input, shape index: {}]   ;;  %s630_s0 = inlined_call_operand.vmem [shape: f32[8,16], index: 0, kind: input, shape index: {}, may-alias: {0,1}]   ;;  %s631_s1 = inlined_call_operand.vmem [shape: f32[8,16], index: 1, kind: input, shape index: {}, may-alias: {0,1}]   ;;  %s632_s5 = inlined_call_operand.vmem [shape: f32[2,1,32], index: 5, kind: input, shape index: {}]   ;;  %s633_s4 = inlined_call_operand.vmem [shape: f32[2,1,32], index: 4, kind: input, shape index: {}]   ;;  %s634_s2 = inlined_call_operand.vmem [shape: s8[8,8], index: 2, kind: input, shape index: {}]   ;;  %s635_s6 = inlined_call_operand.vmem [shape: f32[1,32], index: 6, kind: input, shape index: {}]   ;;  %s636_s7 = inlined_call_operand.vmem [shape: f32[8,32], index: 7, kind: output, shape index: {}]  }
   0x1   :  { %466 = vmatprep.subr.bf16.mxu1 %v519_v0  ;;  %v509_v1 = vld [vmem:[%s629_s3] sm:$0xff]   ;;  %478 = vmatprep.subr.bf16.mxu0 %v519_v0  ;;  %v510_v4 = vld [vmem:[%s629_s3 + $0x8] sm:$0xff]   ;;  %vm336_vm3 = vcmask 1043456   ;;  %v266_v39 = vlaneseq  ;;  %v521_v51 = vmov -1e+30   ;;  %vm306_vm6 = vcmask 64512  }
   0x2   :  { %468 = vmatprep.mubr.msk.bf16.mxu1 %vm520_vm0, %v519_v0  ;;  %v36_v2 = vld [vmem:[%s630_s0] sm:$0xff]  ;;  %480 = vmatprep.mubr.msk.bf16.mxu0 %vm520_vm0, %v519_v0 }
   0x3   :  { %467 = vmatpush3.bf16.msra.mxu1 %v509_v1  ;;  %479 = vmatpush3.bf16.msra.mxu0 %v509_v1  ;;  %v37_v3 = vpack.c.bf16 %v36_v2, %v36_v2  ;;  %v38_v5 = vld [vmem:[%s631_s1] sm:$0xff]  ;;  %v267_v41 = vand.u32 127, %v266_v39  ;;  %v269_v42 = vshrl.u32 %v266_v39, 7 }
   0x4   :  { %472 = vmatprep.subr.bf16.mxu1 %v519_v0  ;;  %v39_v6 = vpack.c.bf16 %v38_v5, %v38_v5  ;;  %490 = vmatprep.subr.bf16.mxu0 %v519_v0  ;;  %v447_v7 = vld [vmem:[%s632_s5] ss:$0 sm:$0xff]  ;;  %v450_v23 = vld [vmem:[%s633_s4 + $0x1] ss:$0 sm:$0xff] }
   0x5   :  { %v449_v8 = vld [vmem:[%s633_s4] ss:$0 sm:$0xff]  ;;  %v448_v32 = vld [vmem:[%s632_s5 + $0x1] ss:$0 sm:$0xff]  ;;  %v270_v44 = vsub.s32 %v267_v41, %v269_v42 }
   0x6   :  { %469 = vmatmul.mubr.msk.bf16.vlgmr.msra.gmra.mrb[0].mxu1 %vm46_vm1, %v37_v3  ;;  %481 = vmatmul.mubr.msk.bf16.vlgmr.msra.gmra.mrb[0].mxu0 %vm46_vm1, %v39_v6  ;;  %v27_v40 = vld [vmem:[%s634_s2] sm:$0x3] }
   0x7   :  { %473 = vmatpush3.bf16.msra.mxu1 %v510_v4  ;;  %474 = vmatprep.mubr.msk.bf16.mxu1 %vm520_vm0, %v519_v0  ;;  %v28_v43 = vunpack.c.0.s8 %v27_v40 }
   0x8   :  { %484 = vmatprep.subr.bf16.mxu1 %v519_v0  ;;  %492 = vmatprep.mubr.msk.bf16.mxu0 %vm520_vm0, %v519_v0 }
   0x9   :  { %v29_v46 = vcvt.s32.f32 %v28_v43 }
   0xb   :  { %vm30_vm4 = vcmp.gt.f32.partialorder %v29_v46, 0.0 }
   0xc   :  { %v31_v52 = vsel %vm30_vm4, 0.0, %v521_v51 }
   0xe   :  { %475 = vmatmul.mubr.msk.bf16.vlgmr.msra.gmra.mrb[4].mxu1 %vm46_vm1, %v37_v3 }
   0xf   :  { %485 = vmatpush3.bf16.msra.mxu1 %v510_v4  ;;  %486 = vmatprep.mubr.msk.bf16.mxu1 %vm520_vm0, %v519_v0 }
  0x16   :  { %487 = vmatmul.mubr.msk.bf16.vlgmr.msra.gmra.mrb[8].mxu1 %vm46_vm1, %v39_v6 }
  0xd9   :  { %v84_v9 = vpop.f32.mrb[0].mxu1  ;;  %v173_v10 = vpop.f32.mrb[0].mxu0 }
  0xda   :  { %v331_v11 = vpack.c.bf16 %v84_v9, %v84_v9  ;;  %v470_v12 = vpop.f32.mrb[1].mxu1  ;;  %v233_v13 = vmul.f32 %v447_v7, %v173_v10  ;;  %v482_v14 = vpop.f32.mrb[1].mxu0  ;;  %v256_v15 = vmul.f32 %v449_v8, %v84_v9 }
  0xdb   :  { %v87_v16 = vpop.f32.mrb[2].mxu1  ;;  %v176_v17 = vpop.f32.mrb[2].mxu0 }
  0xdc   :  { %v471_v18 = vpop.f32.mrb[3].mxu1  ;;  %v258_v19 = vsel %vm235_vm2, %v256_v15, 0.0  ;;  %v483_v20 = vpop.f32.mrb[3].mxu0  ;;  %v338_v21 = vsel %vm336_vm3, %v331_v11, 0  ;;  %v236_v22 = vsel %vm235_vm2, %v233_v13, 0.0 }
  0xdd   :  { %259 = vadd.xlane.f32.xlu0 %v258_v19  ;;  %491 = vmatpush3.bf16.msra.mxu0 %v338_v21  ;;  %v453_v20 = vld [vmem:[%s635_s6] ss:$0 sm:$0xff] }
  0xde   :  { %496 = vmatprep.subr.bf16.mxu0 %v519_v0 }
  0xe1   :  { %237 = vadd.xlane.f32.xlu0 %v236_v22  ;;  %v130_v24 = vpop.f32.mrb[4].mxu1 }
  0xe2   :  { %v332_v25 = vpack.c.bf16 %v130_v24, %v130_v24  ;;  %v476_v26 = vpop.f32.mrb[5].mxu1  ;;  %v257_v27 = vmul.f32 %v450_v23, %v130_v24 }
  0xe3   :  { %v133_v28 = vpop.f32.mrb[6].mxu1 }
  0xe4   :  { %v477_v29 = vpop.f32.mrb[7].mxu1  ;;  %v261_v30 = vsel %vm235_vm2, %v257_v27, 0.0  ;;  %v604_v31 = vsel %vm336_vm3, %v332_v25, 0 }
  0xe5   :  { %262 = vadd.xlane.f32.xlu1 %v261_v30 }
  0xe9   :  { %v213_v33 = vpop.f32.mrb[8].mxu1 }
  0xea   :  { %v234_v34 = vmul.f32 %v448_v32, %v213_v33  ;;  %v488_v35 = vpop.f32.mrb[9].mxu1 }
  0xeb   :  { %v216_v36 = vpop.f32.mrb[10].mxu1 }
  0xec   :  { %v489_v37 = vpop.f32.mrb[11].mxu1  ;;  %v239_v38 = vsel %vm235_vm2, %v234_v34, 0.0 }
  0xed   :  { %240 = vadd.xlane.f32.xlu1 %v239_v38 }
 0x16a   :  { %v260_v45 = vpop.xlane.xlu0 %259 }
 0x16b   :  { %v271_v47 = vrot.slane %v260_v45, %v270_v44 }
 0x16e   :  { %v238_v48 = vpop.xlane.xlu0 %237 }
 0x16f   :  { %v296_v49 = vadd.f32 %v271_v47, %v238_v48 }
 0x171   :  { %vm298_vm5 = vcmp.gt.f32.partialorder %v296_v49, 0.0  ;;  %v300_v50 = vmul.f32 0.2, %v296_v49 }
 0x172   :  { %v263_v55 = vpop.xlane.xlu1 %262 }
 0x173   :  { %v302_v53 = vsel %vm298_vm5, %v296_v49, %v300_v50  ;;  %v275_v57 = vrot.slane %v263_v55, %v270_v44 }
 0x174   :  { %v304_v54 = vadd.f32 %v302_v53, %v31_v52 }
 0x176   :  { %v307_v56 = vsel %vm306_vm6, %v304_v54, -inf }
 0x177   :  { %308 = vmax.xlane.f32.xlu0 %v307_v56 }
 0x17a   :  { %v241_v58 = vpop.xlane.xlu1 %240 }
 0x17b   :  { %v297_v59 = vadd.f32 %v275_v57, %v241_v58 }
 0x17d   :  { %vm299_vm7 = vcmp.gt.f32.partialorder %v297_v59, 0.0  ;;  %v301_v60 = vmul.f32 0.2, %v297_v59 }
 0x17f   :  { %v303_v61 = vsel %vm299_vm7, %v297_v59, %v301_v60 }
 0x180   :  { %v305_v62 = vadd.f32 %v303_v61, %v31_v52 }
 0x182   :  { %v310_v63 = vsel %vm306_vm6, %v305_v62, -inf }
 0x183   :  { %311 = vmax.xlane.f32.xlu1 %v310_v63 }
 0x204   :  { %v309_v1 = vpop.xlane.xlu0 %308 }
 0x205   :  { %v313_v2 = vsub.f32 %v304_v54, %v309_v1 }
 0x207   :  { %v315_v3 = vmul.f32 1.442695, %v313_v2 }
 0x209   :  { %511 = vpow2.f32 %v315_v3 }
 0x210   :  { %v312_v4 = vpop.xlane.xlu1 %311 }
 0x211   :  { %v314_v5 = vsub.f32 %v305_v62, %v312_v4 }
 0x213   :  { %v512_v6 = vpop.eup %511  ;;  %v317_v7 = vmul.f32 1.442695, %v314_v5 }
 0x214   :  { %v319_v8 = vsel %vm306_vm6, %v512_v6, 0.0 }
 0x215   :  { %513 = vpow2.f32 %v317_v7  ;;  %320 = vadd.xlane.f32.xlu0 %v319_v8 }
 0x21f   :  { %v514_v9 = vpop.eup %513 }
 0x220   :  { %v322_v10 = vsel %vm306_vm6, %v514_v9, 0.0 }
 0x221   :  { %323 = vadd.xlane.f32.xlu1 %v322_v10 }
 0x2a2   :  { %v321_v11 = vpop.xlane.xlu0 %320 }
 0x2a3   :  { %515 = vrcp.f32 %v321_v11 }
 0x2ad   :  { %v516_v12 = vpop.eup %515 }
 0x2ae   :  { %v327_v13 = vmul.f32 %v516_v12, %v512_v6  ;;  %v324_v14 = vpop.xlane.xlu1 %323 }
 0x2af   :  { %517 = vrcp.f32 %v324_v14 }
 0x2b0   :  { %v329_v15 = vpack.c.bf16 %v327_v13, %v327_v13 }
 0x2b2   :  { %493 = vmatmul.mubr.msk.bf16.vlgmr.msra.gmra.mrb[4].mxu0 %vm306_vm6, %v329_v15 }
 0x2b3   :  { %497 = vmatpush3.bf16.msra.mxu0 %v604_v31  ;;  %498 = vmatprep.mubr.msk.bf16.mxu0 %vm520_vm0, %v519_v0 }
 0x2b9   :  { %v518_v16 = vpop.eup %517 }
 0x2ba   :  { %v328_v17 = vmul.f32 %v518_v16, %v514_v9 }
 0x2bc   :  { %v330_v18 = vpack.c.bf16 %v328_v17, %v328_v17 }
 0x2be   :  { %499 = vmatmul.mubr.msk.bf16.vlgmr.msra.gmra.mrb[4].mxu0 %vm306_vm6, %v330_v18 }
 0x391   :  { %v420_v19 = vpop.f32.mrb[4].mxu0 }
 0x392   :  { %v427_v21 = vmul.f32 0.5, %v420_v19  ;;  %v500_v22 = vpop.f32.mrb[5].mxu0 }
 0x393   :  { %v423_v23 = vpop.f32.mrb[6].mxu0 }
 0x394   :  { %v435_v24 = vadd.f32 %v453_v20, %v427_v21  ;;  %v501_v25 = vpop.f32.mrb[7].mxu0 }
 0x396   :  { %436 = vst.msk [vmem:[%s636_s7] sm:$0xff] %vm235_vm2, %v435_v24 }

// kernel: run.4
= control target key start
LH: loop header
LB: loop body
LE: loop exit
PB: predicated region body
PF: predicated region fallthrough
CT: control target
= control target key end

     0   :  { %v726_v0 = vmov 0.0   ;;  %vm727_vm0 = vmmov 0   ;;  %vm65_vm1 = vcmask 261120   ;;  %vm360_vm2 = vcmask 1043456   ;;  %s900_s3 = inlined_call_operand.vmem [shape: bf16[2,32,32], index: 3, kind: input, shape index: {}]   ;;  %s901_s0 = inlined_call_operand.vmem [shape: f32[8,32], index: 0, kind: input, shape index: {}, may-alias: {0,1}]   ;;  %s902_s1 = inlined_call_operand.vmem [shape: f32[8,32], index: 1, kind: input, shape index: {}, may-alias: {0,1}]   ;;  %s903_s4 = inlined_call_operand.vmem [shape: f32[2,1,32], index: 4, kind: input, shape index: {}]   ;;  %s904_s5 = inlined_call_operand.vmem [shape: f32[2,1,32], index: 5, kind: input, shape index: {}]   ;;  %s905_s2 = inlined_call_operand.vmem [shape: s8[8,8], index: 2, kind: input, shape index: {}]   ;;  %s906_s8 = inlined_call_operand.vmem [shape: bf16[32,32], index: 8, kind: input, shape index: {}]   ;;  %s907_s7 = inlined_call_operand.vmem [shape: bf16[32,32], index: 7, kind: input, shape index: {}]   ;;  %s908_s6 = inlined_call_operand.vmem [shape: f32[1,32], index: 6, kind: input, shape index: {}]   ;;  %s909_s9 = inlined_call_operand.vmem [shape: f32[1,32], index: 9, kind: input, shape index: {}]   ;;  %s910_s10 = inlined_call_operand.vmem [shape: f32[8,32], index: 10, kind: output, shape index: {}]  }
   0x1   :  { %641 = vmatprep.subr.bf16.mxu0 %v726_v0  ;;  %649 = vmatprep.subr.bf16.mxu1 %v726_v0  ;;  %v708_v1 = vld [vmem:[%s900_s3] sm:$0xff]   ;;  %v709_v2 = vld [vmem:[%s900_s3 + $0x10] sm:$0xff]   ;;  %v710_v3 = vld [vmem:[%s900_s3 + $0x8] sm:$0xff]   ;;  %v290_v41 = vlaneseq  ;;  %v728_v57 = vmov -1e+30   ;;  %vm330_vm6 = vcmask 64512  }
   0x2   :  { %645 = vmatprep.mubr.msk.bf16.mxu0 %vm727_vm0, %v726_v0  ;;  %653 = vmatprep.mubr.msk.bf16.mxu1 %vm727_vm0, %v726_v0  ;;  %v711_v4 = vld [vmem:[%s900_s3 + $0x18] sm:$0xff]   ;;  %v49_v5 = vld [vmem:[%s901_s0] sm:$0xff] }
   0x3   :  { %642 = vmatpush3.bf16.msra.mxu0 %v708_v1  ;;  %650 = vmatpush3.bf16.msra.mxu1 %v709_v2  ;;  %v50_v6 = vpack.c.bf16 %v49_v5, %v49_v5  ;;  %v814_v7 = vld [vmem:[%s902_s1] sm:$0xff]  ;;  %v291_v43 = vand.u32 127, %v290_v41  ;;  %v293_v44 = vshrl.u32 %v290_v41, 7 }
   0x4   :  { %643 = vmatprep.subr.bf16.mxu0 %v726_v0  ;;  %651 = vmatprep.subr.bf16.mxu1 %v726_v0  ;;  %v824_v8 = vpack.c.bf16 %v814_v7, %v814_v7  ;;  %v607_v9 = vld [vmem:[%s903_s4] ss:$0 sm:$0xff]  ;;  %v608_v10 = vld [vmem:[%s903_s4 + $0x1] ss:$0 sm:$0xff] }
   0x5   :  { %v605_v27 = vld [vmem:[%s904_s5] ss:$0 sm:$0xff]  ;;  %v606_v28 = vld [vmem:[%s904_s5 + $0x1] ss:$0 sm:$0xff]  ;;  %v294_v46 = vsub.s32 %v291_v43, %v293_v44 }
   0x6   :  { %v36_v42 = vld [vmem:[%s905_s2] sm:$0x3] }
   0x7   :  { %644 = vmatpush3.bf16.msra.mxu0 %v710_v3  ;;  %652 = vmatpush3.bf16.msra.mxu1 %v711_v4  ;;  %v37_v45 = vunpack.c.0.s8 %v36_v42 }
   0x8   :  { %657 = vmatprep.subr.bf16.mxu0 %v726_v0  ;;  %665 = vmatprep.subr.bf16.mxu1 %v726_v0 }
   0x9   :  { %v38_v49 = vcvt.s32.f32 %v37_v45 }
   0xa   :  { %646 = vmatmul.mubr.msk.bf16.vlgmr.msra.gmra.mrb[0].mxu0 %vm65_vm1, %v50_v6  ;;  %654 = vmatmul.mubr.msk.bf16.vlgmr.msra.gmra.mrb[0].mxu1 %vm65_vm1, %v50_v6 }
   0xb   :  { %658 = vmatpush3.bf16.msra.mxu0 %v708_v1  ;;  %666 = vmatpush3.bf16.msra.mxu1 %v709_v2  ;;  %vm39_vm3 = vcmp.gt.f32.partialorder %v38_v49, 0.0 }
   0xc   :  { %659 = vmatprep.subr.bf16.mxu0 %v726_v0  ;;  %667 = vmatprep.subr.bf16.mxu1 %v726_v0  ;;  %v40_v58 = vsel %vm39_vm3, 0.0, %v728_v57 }
   0xd   :  { %661 = vmatprep.mubr.msk.bf16.mxu0 %vm727_vm0, %v726_v0  ;;  %669 = vmatprep.mubr.msk.bf16.mxu1 %vm727_vm0, %v726_v0 }
   0xf   :  { %660 = vmatpush3.bf16.msra.mxu0 %v710_v3  ;;  %668 = vmatpush3.bf16.msra.mxu1 %v711_v4 }
  0x10   :  { %673 = vmatprep.subr.bf16.mxu0 %v726_v0  ;;  %685 = vmatprep.subr.bf16.mxu1 %v726_v0 }
  0x12   :  { %662 = vmatmul.mubr.msk.bf16.vlgmr.msra.gmra.mrb[4].mxu0 %vm65_vm1, %v824_v8  ;;  %670 = vmatmul.mubr.msk.bf16.vlgmr.msra.gmra.mrb[4].mxu1 %vm65_vm1, %v824_v8 }
  0x13   :  { %675 = vmatprep.mubr.msk.bf16.mxu0 %vm727_vm0, %v726_v0  ;;  %689 = vmatprep.mubr.msk.bf16.mxu1 %vm727_vm0, %v726_v0 }
  0xdd   :  { %v103_v11 = vpop.f32.mrb[0].mxu0  ;;  %v155_v14 = vpop.f32.mrb[0].mxu1 }
  0xde   :  { %v355_v12 = vpack.c.bf16 %v103_v11, %v103_v11  ;;  %v647_v13 = vpop.f32.mrb[1].mxu0  ;;  %v280_v15 = vmul.f32 %v607_v9, %v103_v11  ;;  %v356_v17 = vpack.c.bf16 %v155_v14, %v155_v14  ;;  %v655_v18 = vpop.f32.mrb[1].mxu1  ;;  %v281_v19 = vmul.f32 %v608_v10, %v155_v14 }
  0xdf   :  { %v106_v16 = vpop.f32.mrb[2].mxu0  ;;  %v158_v23 = vpop.f32.mrb[2].mxu1 }
  0xe0   :  { %v648_v20 = vpop.f32.mrb[3].mxu0  ;;  %v362_v21 = vsel %vm360_vm2, %v355_v12, 0  ;;  %v282_v22 = vsel %vm65_vm1, %v280_v15, 0.0  ;;  %v656_v24 = vpop.f32.mrb[3].mxu1  ;;  %v285_v25 = vsel %vm65_vm1, %v281_v19, 0.0  ;;  %v846_v26 = vsel %vm360_vm2, %v356_v17, 0 }
  0xe1   :  { %674 = vmatpush3.bf16.msra.mxu0 %v362_v21  ;;  %283 = vadd.xlane.f32.xlu0 %v282_v22  ;;  %v712_v23 = vld [vmem:[%s906_s8] sm:$0xff]   ;;  %v713_v24 = vld [vmem:[%s906_s8 + $0x8] sm:$0xff]  }
  0xe2   :  { %286 = vadd.xlane.f32.xlu1 %v285_v25  ;;  %679 = vmatprep.subr.bf16.mxu0 %v726_v0 }
  0xe3   :  { %686 = vmatpush3.bf16.msra.mxu1 %v712_v23 }
  0xe4   :  { %687 = vmatprep.subr.bf16.mxu1 %v726_v0 }
  0xe5   :  { %v198_v29 = vpop.f32.mrb[4].mxu0  ;;  %v238_v31 = vpop.f32.mrb[4].mxu1 }
  0xe6   :  { %v258_v30 = vmul.f32 %v605_v27, %v198_v29  ;;  %v663_v32 = vpop.f32.mrb[5].mxu0  ;;  %v259_v33 = vmul.f32 %v606_v28, %v238_v31  ;;  %v671_v35 = vpop.f32.mrb[5].mxu1 }
  0xe7   :  { %v201_v34 = vpop.f32.mrb[6].mxu0  ;;  %v241_v38 = vpop.f32.mrb[6].mxu1  ;;  %688 = vmatpush3.bf16.msra.mxu1 %v713_v24  ;;  %v714_v32 = vld [vmem:[%s907_s7] sm:$0xff]  }
  0xe8   :  { %v664_v36 = vpop.f32.mrb[7].mxu0  ;;  %v260_v37 = vsel %vm65_vm1, %v258_v30, 0.0  ;;  %v263_v39 = vsel %vm65_vm1, %v259_v33, 0.0  ;;  %v672_v40 = vpop.f32.mrb[7].mxu1  ;;  %693 = vmatprep.subr.bf16.mxu1 %v726_v0  ;;  %v715_v34 = vld [vmem:[%s907_s7 + $0x8] sm:$0xff]  }
  0xe9   :  { %261 = vadd.xlane.f32.xlu0 %v260_v37  ;;  %264 = vadd.xlane.f32.xlu1 %v263_v39  ;;  %v618_v40 = vld [vmem:[%s909_s9] ss:$0 sm:$0xff] }
 0x16e   :  { %v284_v48 = vpop.xlane.xlu0 %283 }
 0x16f   :  { %v287_v47 = vpop.xlane.xlu1 %286  ;;  %v295_v51 = vrot.slane %v284_v48, %v294_v46 }
 0x170   :  { %v299_v50 = vrot.slane %v287_v47, %v294_v46 }
 0x176   :  { %v262_v52 = vpop.xlane.xlu0 %261  ;;  %v265_v53 = vpop.xlane.xlu1 %264 }
 0x177   :  { %v320_v54 = vadd.f32 %v295_v51, %v262_v52  ;;  %v321_v55 = vadd.f32 %v299_v50, %v265_v53 }
 0x179   :  { %vm322_vm4 = vcmp.gt.f32.partialorder %v320_v54, 0.0  ;;  %v324_v56 = vmul.f32 0.2, %v320_v54  ;;  %vm323_vm5 = vcmp.gt.f32.partialorder %v321_v55, 0.0  ;;  %v325_v59 = vmul.f32 0.2, %v321_v55 }
 0x17b   :  { %v326_v60 = vsel %vm322_vm4, %v320_v54, %v324_v56  ;;  %v327_v61 = vsel %vm323_vm5, %v321_v55, %v325_v59 }
 0x17c   :  { %v328_v62 = vadd.f32 %v326_v60, %v40_v58  ;;  %v329_v63 = vadd.f32 %v327_v61, %v40_v58 }
 0x17e   :  { %v331_v1 = vsel %vm330_vm6, %v328_v62, -inf  ;;  %v334_v2 = vsel %vm330_vm6, %v329_v63, -inf }
 0x17f   :  { %332 = vmax.xlane.f32.xlu0 %v331_v1  ;;  %335 = vmax.xlane.f32.xlu1 %v334_v2 }
 0x20c   :  { %v333_v3 = vpop.xlane.xlu0 %332  ;;  %v336_v4 = vpop.xlane.xlu1 %335 }
 0x20d   :  { %v337_v5 = vsub.f32 %v328_v62, %v333_v3  ;;  %v338_v6 = vsub.f32 %v329_v63, %v336_v4 }
 0x20f   :  { %v339_v9 = vmul.f32 1.442695, %v337_v5  ;;  %v341_v10 = vmul.f32 1.442695, %v338_v6 }
 0x211   :  { %716 = vpow2.f32 %v339_v9 }
 0x212   :  { %718 = vpow2.f32 %v341_v10 }
 0x21b   :  { %v717_v11 = vpop.eup %716 }
 0x21c   :  { %v719_v12 = vpop.eup %718  ;;  %v343_v13 = vsel %vm330_vm6, %v717_v11, 0.0 }
 0x21d   :  { %v346_v14 = vsel %vm330_vm6, %v719_v12, 0.0  ;;  %344 = vadd.xlane.f32.xlu0 %v343_v13 }
 0x21e   :  { %347 = vadd.xlane.f32.xlu1 %v346_v14 }
 0x2aa   :  { %v345_v15 = vpop.xlane.xlu0 %344 }
 0x2ab   :  { %720 = vrcp.f32 %v345_v15  ;;  %v348_v16 = vpop.xlane.xlu1 %347 }
 0x2ac   :  { %722 = vrcp.f32 %v348_v16 }
 0x2b5   :  { %v721_v17 = vpop.eup %720 }
 0x2b6   :  { %v351_v18 = vmul.f32 %v721_v17, %v717_v11  ;;  %v723_v20 = vpop.eup %722 }
 0x2b7   :  { %v352_v21 = vmul.f32 %v723_v20, %v719_v12 }
 0x2b8   :  { %v353_v19 = vpack.c.bf16 %v351_v18, %v351_v18 }
 0x2b9   :  { %v354_v22 = vpack.c.bf16 %v352_v21, %v352_v21 }
 0x2ba   :  { %676 = vmatmul.mubr.msk.bf16.vlgmr.msra.gmra.mrb[8].mxu0 %vm330_vm6, %v353_v19 }
 0x2bb   :  { %680 = vmatpush3.bf16.msra.mxu0 %v846_v26  ;;  %681 = vmatprep.mubr.msk.bf16.mxu0 %vm727_vm0, %v726_v0  ;;  %v611_v26 = vld [vmem:[%s908_s6] ss:$0 sm:$0xff] }
 0x2c6   :  { %682 = vmatmul.mubr.msk.bf16.vlgmr.msra.gmra.mrb[8].mxu0 %vm330_vm6, %v354_v22 }
 0x399   :  { %v444_v25 = vpop.f32.mrb[8].mxu0 }
 0x39a   :  { %v451_v27 = vmul.f32 0.5, %v444_v25  ;;  %v683_v28 = vpop.f32.mrb[9].mxu0 }
 0x39b   :  { %v447_v29 = vpop.f32.mrb[10].mxu0 }
 0x39c   :  { %v459_v30 = vadd.f32 %v611_v26, %v451_v27  ;;  %v684_v31 = vpop.f32.mrb[11].mxu0 }
 0x39e   :  { %v466_v33 = vpack.c.bf16 %v459_v30, %v459_v30 }
 0x3a0   :  { %690 = vmatmul.mubr.msk.bf16.vlgmr.msra.gmra.mrb[8].mxu1 %vm65_vm1, %v466_v33 }
 0x3a1   :  { %694 = vmatpush3.bf16.msra.mxu1 %v714_v32  ;;  %697 = vmatprep.mubr.msk.bf16.mxu1 %vm727_vm0, %v726_v0 }
 0x3a2   :  { %695 = vmatprep.subr.bf16.mxu1 %v726_v0 }
 0x3a5   :  { %696 = vmatpush3.bf16.msra.mxu1 %v715_v34 }
 0x3a8   :  { %698 = vmatmul.mubr.msk.bf16.vlgmr.msra.gmra.mrb[12].mxu1 %vm65_vm1, %v824_v8 }
 0x473   :  { %v520_v35 = vpop.f32.mrb[8].mxu1 }
 0x474   :  { %v691_v36 = vpop.f32.mrb[9].mxu1 }
 0x475   :  { %v523_v37 = vpop.f32.mrb[10].mxu1 }
 0x476   :  { %v692_v38 = vpop.f32.mrb[11].mxu1 }
 0x47b   :  { %v575_v39 = vpop.f32.mrb[12].mxu1 }
 0x47c   :  { %v576_v41 = vadd.f32 %v575_v39, %v520_v35  ;;  %v699_v42 = vpop.f32.mrb[13].mxu1 }
 0x47d   :  { %v578_v43 = vpop.f32.mrb[14].mxu1 }
 0x47e   :  { %v588_v44 = vadd.f32 %v618_v40, %v576_v41  ;;  %v700_v45 = vpop.f32.mrb[15].mxu1 }
 0x480   :  { %724 = vtanh.f32 %v588_v44 }
 0x48a   :  { %v725_v0 = vpop.eup %724 }
 0x48b   :  { %v590_v46 = vadd.f32 %v725_v0, %v814_v7 }
 0x48d   :  { %v591_v47 = vsub.f32 %v590_v46, %v459_v30 }
 0x48f   :  { %592 = vst.msk [vmem:[%s910_s10] sm:$0xff] %vm65_vm1, %v591_v47 }

// kernel: run.5
= control target key start
LH: loop header
LB: loop body
LE: loop exit
PB: predicated region body
PF: predicated region fallthrough
CT: control target
= control target key end

     0   :  { %s2658_s22 = smov 0   ;;  %s2660_s23 = smov 0   ;;  %s2966_s0 = inlined_call_operand.vmem [shape: f32[2,4,32], index: 0, kind: input, shape index: {}]   ;;  %s2967_s1 = inlined_call_operand.vmem [shape: f32[4,32], index: 1, kind: input, shape index: {}]   ;;  %s2968_s2 = inlined_call_operand.vmem [shape: f32[4,4], index: 2, kind: input, shape index: {}]   ;;  %s2969_s3 = inlined_call_operand.vmem [shape: f32[2,1,32], index: 3, kind: input, shape index: {}]   ;;  %s2970_s4 = inlined_call_operand.vmem [shape: f32[2,1,32], index: 4, kind: input, shape index: {}]   ;;  %s2971_s5 = inlined_call_operand.vmem [shape: bf16[2,6,32,16], index: 5, kind: input, shape index: {}]   ;;  %s2972_s6 = inlined_call_operand.vmem [shape: f32[2,6,1,16], index: 6, kind: input, shape index: {}]   ;;  %s2973_s7 = inlined_call_operand.vmem [shape: bf16[2,2,16,32], index: 7, kind: input, shape index: {}]   ;;  %s2974_s8 = inlined_call_operand.vmem [shape: f32[2,1,32], index: 8, kind: input, shape index: {}]   ;;  %s2975_s9 = inlined_call_operand.vmem [shape: f32[2,1,32], index: 9, kind: input, shape index: {}]   ;;  %s2976_s10 = inlined_call_operand.vmem [shape: f32[2,1,32], index: 10, kind: input, shape index: {}]   ;;  %s2977_s11 = inlined_call_operand.vmem [shape: bf16[2,32,128], index: 11, kind: input, shape index: {}]   ;;  %s2978_s12 = inlined_call_operand.vmem [shape: f32[2,1,128], index: 12, kind: input, shape index: {}]   ;;  %s2979_s13 = inlined_call_operand.vmem [shape: bf16[2,128,32], index: 13, kind: input, shape index: {}]   ;;  %s2980_s14 = inlined_call_operand.vmem [shape: f32[2,1,32], index: 14, kind: input, shape index: {}]   ;;  %s2981_s15 = inlined_call_operand.vmem [shape: f32[1,32], index: 15, kind: input, shape index: {}]   ;;  %s2982_s16 = inlined_call_operand.vmem [shape: f32[1,32], index: 16, kind: input, shape index: {}]   ;;  %s2983_s17 = inlined_call_operand.vmem [shape: bf16[32,32], index: 17, kind: input, shape index: {}]   ;;  %s2984_s18 = inlined_call_operand.vmem [shape: bf16[32,32], index: 18, kind: input, shape index: {}]   ;;  %s2985_s19 = inlined_call_operand.vmem [shape: f32[1,32], index: 19, kind: input, shape index: {}]   ;;  %s2986_s20 = inlined_call_operand.vmem [shape: f32[2,4,32], index: 20, kind: output, shape index: {}]  }
   0x1   :  { %2993 = sst [smem:[#allocation10_spill]] %s2966_s0  ;;  %s2662_s24 = smov 0  }
   0x2   :  { %2994 = sst [smem:[#allocation11_spill]] %s2967_s1  ;;  %s2656_s1 = smov 0  }
   0x3   :  { %2995 = sst [smem:[#allocation12_spill]] %s2968_s2  ;;  %s2664_s2 = smov 0  }
   0x4   :  { %2996 = sst [smem:[#allocation13_spill]] %s2969_s3 }
   0x5   :  { %2997 = sst [smem:[#allocation14_spill]] %s2970_s4 }
   0x6   :  { %2998 = sst [smem:[#allocation15_spill]] %s2971_s5 }
   0x7   :  { %2999 = sst [smem:[#allocation16_spill]] %s2972_s6 }
   0x8   :  { %3000 = sst [smem:[#allocation17_spill]] %s2981_s15 }
   0x9   :  { %3001 = sst [smem:[#allocation18_spill]] %s2982_s16 }
   0xa   :  { %3002 = sst [smem:[#allocation19_spill]] %s2983_s17 }
   0xb   :  { %3003 = sst [smem:[#allocation20_spill]] %s2984_s18 }
   0xc   :  { %3004 = sst [smem:[#allocation21_spill]] %s2985_s19 }
   0xd LB: > { %3005 = sst [smem:[#allocation3_spill]] %s2529_s1  ;;  %s39_s25 = sadd.s32 1, %s2537_s23  ;;  %s2545_s2 = sphi %s2664_s2, %s30_s2   ;;  %s2541_s24 = sphi %s2662_s24, %s3040_s24   ;;  %s2537_s23 = sphi %s2660_s23, %s3039_s23   ;;  %s2533_s22 = sphi %s2658_s22, %s3038_s22   ;;  %s2529_s1 = sphi %s2656_s1, %s3037_s1  }
   0xe   : > { %3006 = sst [smem:[#allocation4_spill]] %s2537_s23  ;;  %s42_s3 = sadd.s32 1, %s2541_s24 }
   0xf   : > { %3007 = sst [smem:[#allocation5_spill]] %s2541_s24  ;;  %p40_p0 = scmp.ge.s32.totalorder %s39_s25, 2 }
  0x10   : > { %3008 = sst [smem:[#allocation6_spill]] %s2545_s2  ;;  %p2165_p1 = scmp.ge.s32.totalorder %s2545_s2, 1 }
  0x11   : > { %p678_p2 = scmp.lt.s32.totalorder %s2545_s2, 5  ;;  %s3042_s25 = smov (%p40_p0, %s39_s25), 0 }
  0x12   : > { %3009 = sst [smem:[#allocation7_spill]] %s3042_s25  ;;  %s3044_s3 = smov (!%p40_p0, %s42_s3), %s2541_s24 }
  0x13   : > { %p679_p3 = pnand %p2165_p1, %p678_p2  ;;  %p44_p4 = scmp.ge.s32.totalorder %s3044_s3, 2 }
  0x15   : > { %s3046_s3 = smov (%p44_p4, %s3044_s3), 0  ;;  %682 = sbr.rel (%p679_p3) target bundleno = 2890 (0xb4a), region = 100 }
  0x16   : > { %3010 = sst [smem:[#allocation8_spill]] %s3046_s3 }
  0x1c   : > { %p779_p5 = scmp.lt.s32.totalorder %s2533_s22, 1  ;;  %p783_p6 = scmp.lt.s32.totalorder %s2529_s1, 1 }
  0x1d   : > { %s3011_s29 = sld [smem:[#allocation10_spill]]  ;;  %s3015_s5 = sld [smem:[#allocation15_spill]] }
  0x1e   : > { %s3048_s22 = smov (!%p779_p5, %s2533_s22), 1  ;;  %s3016_s6 = sld [smem:[#allocation16_spill]] }
  0x1f   : > { %s2690_s26 = scalar_select %p783_p6, %s2529_s1, 1 }
  0x20   : > { %s2166_s27 = sshll.u32 %s3048_s22, 2 }
  0x21   : > { %s2417_s16 = smul.u32 96, %s2690_s26  ;;  %s2238_s18 = sshll.u32 %s2690_s26, 4 }
  0x22   : > { %s2418_s15 = smul.u32 6, %s2690_s26  ;;  %s811_s25 = scalar_lea.vmem %s2976_s10, %s2690_s26 }
  0x23   : > { %s2695_s30 = scalar_lea.vmem %s3011_s29, %s2166_s27  ;;  %s2711_s22 = scalar_lea.vmem %s3015_s5, %s2417_s16 }
  0x24   : > { %3012 = sst [smem:[#allocation9_spill]] %s2695_s30  ;;  %s2716_s29 = scalar_lea.vmem %s2973_s7, %s2238_s18 }
  0x25   : > { %s2721_s3 = scalar_lea.vmem %s3016_s6, %s2418_s15  ;;  %s2738_s5 = scalar_lea.vmem %s2977_s11, %s2238_s18 }
  0x26   : > { %s2240_s6 = sshll.u32 %s2690_s26, 6  ;;  %s827_s2 = scalar_lea.vmem %s2980_s14, %s2690_s26 }
  0x27   : > { %s2752_s17 = scalar_lea.vmem %s2979_s13, %s2240_s6  ;;  %s2757_s28 = scalar_lea.vmem %s2986_s20, %s2166_s27 }
  0x28   : > { %s3017_s18 = sld [smem:[#allocation3_spill]] }
  0x2e   : > { %p2175_p7 = scmp.ne.s32.totalorder %s3017_s18, 0 }
  0x2f   : > { %s3018_s4 = sld [smem:[#allocation9_spill]] (!%p2175_p7)  ;;  %s3019_s0 = sld [smem:[#allocation11_spill]] (!%p2175_p7)  ;;  %vm840_vm0 = vcmask (!%p2175_p7), 257024  }
  0x30   : > { %836 = sbr.rel (%p2175_p7) target bundleno = 58 (0x3a), region = 104 }
  0x35   : > { %v837_v0 = vld [vmem:[%s3018_s4] sm:$0xf] (!%p2175_p7) }
  0x36   : > { %v838_v1 = vld [vmem:[%s3019_s0] sm:$0xf] (!%p2175_p7) }
  0x37   : > { %v839_v2 = vadd.f32 %v838_v1, %v837_v0 }
  0x39   : > { %841 = vst.msk [vmem:[#allocation2] sm:$0xf] %vm840_vm0, %v839_v2 }
  0x3a PF: > { %vm845_vm1 = vcmask 257024   ;;  %v2463_v10 = vld [vmem:[%s2711_s22] sm:$0xff]   ;;  %v2464_v11 = vld [vmem:[%s2711_s22 + $0x30] sm:$0xff]   ;;  %v2547_v12 = vmov 0.0   ;;  %v2465_v13 = vld [vmem:[%s2711_s22 + $0x8] sm:$0xff]   ;;  %vm2548_vm2 = vmmov 0   ;;  %s3025_s4 = scalar_lea.vmem %s2974_s8, %s2690_s26  ;;  %s3026_s6 = scalar_lea.vmem %s2975_s9, %s2690_s26 }
  0x3b   : > { %2289 = vmatprep.subr.bf16.mxu0 %v2547_v12  ;;  %2313 = vmatprep.subr.bf16.mxu1 %v2547_v12  ;;  %v2466_v14 = vld [vmem:[%s2711_s22 + $0x38] sm:$0xff]   ;;  %s3020_s0 = sld [smem:[#allocation13_spill]]  ;;  %s3022_s21 = sld [smem:[#allocation14_spill]]  ;;  %vm953_vm3 = vcmask 261120   ;;  %v2467_v24 = vld [vmem:[%s2711_s22 + $0x10] sm:$0xff]   ;;  %v2471_v29 = vld [vmem:[%s2711_s22 + $0x20] sm:$0xff]  }
  0x3c   : > { %2290 = vmatpush3.bf16.msra.mxu0 %v2463_v10  ;;  %2314 = vmatpush3.bf16.msra.mxu1 %v2464_v11  ;;  %v2468_v25 = vld [vmem:[%s2711_s22 + $0x50] sm:$0xff]   ;;  %v2469_v27 = vld [vmem:[%s2711_s22 + $0x18] sm:$0xff]   ;;  %v2472_v30 = vld [vmem:[%s2711_s22 + $0x28] sm:$0xff]   ;;  %vm1264_vm4 = vcmask 130048   ;;  %vm1388_vm5 = vcmask 1041408   ;;  %s3024_s1 = sld [smem:[#allocation12_spill]] }
  0x3d   : > { %2291 = vmatprep.subr.bf16.mxu0 %v2547_v12  ;;  %2315 = vmatprep.subr.bf16.mxu1 %v2547_v12  ;;  %v2470_v28 = vld [vmem:[%s2711_s22 + $0x58] sm:$0xff]   ;;  %v2473_v31 = vld [vmem:[%s2711_s22 + $0x40] sm:$0xff]   ;;  %v2474_v32 = vld [vmem:[%s2711_s22 + $0x48] sm:$0xff]   ;;  %vm1357_vm6 = vcmask 27648   ;;  %vm1384_vm7 = vcmask 31744   ;;  %s3028_s19 = sld [smem:[#allocation3_spill]] }
  0x3e   : > { %2293 = vmatprep.mubr.msk.bf16.mxu0 %vm2548_vm2, %v2547_v12  ;;  %2317 = vmatprep.mubr.msk.bf16.mxu1 %vm2548_vm2, %v2547_v12  ;;  %v2181_v33 = vld [vmem:[%s2721_s3 + $0x3] ss:$0 sm:$0xff]  ;;  %v2179_v45 = vld [vmem:[%s2721_s3 + $0x1] ss:$0 sm:$0xff]  ;;  %v2183_v46 = vld [vmem:[%s2721_s3 + $0x5] ss:$0 sm:$0xff] }
  0x3f   : > { %v2180_v61 = vld [vmem:[%s2721_s3 + $0x2] ss:$0 sm:$0xff]  ;;  %v2178_v62 = vld [vmem:[%s2721_s3] ss:$0 sm:$0xff] }
  0x40   : > { %v2764_v3 = vld [vmem:[#allocation2] sm:$0xf]  ;;  %2292 = vmatpush3.bf16.msra.mxu0 %v2465_v13  ;;  %2316 = vmatpush3.bf16.msra.mxu1 %v2466_v14 }
  0x41   : > { %v846_v4 = vsel %vm845_vm1, %v2764_v3, 0.0  ;;  %2297 = vmatprep.subr.bf16.mxu0 %v2547_v12  ;;  %2329 = vmatprep.subr.bf16.mxu1 %v2547_v12  ;;  %s3021_s23 = scalar_lea.vmem %s3020_s0, %s2690_s26  ;;  %s3023_s16 = scalar_lea.vmem %s3022_s21, %s2690_s26 }
  0x42   : > { %847 = vadd.xlane.f32.xlu0 %v846_v4  ;;  %v2176_v19 = vld [vmem:[%s3021_s23] ss:$0 sm:$0xff]  ;;  %s3027_s23 = scalar_lea.vmem %s2978_s12, %s2690_s26 }
  0x43   : > { %v2177_v21 = vld [vmem:[%s3023_s16] ss:$0 sm:$0xff]  ;;  %p2226_p8 = scmp.ne.s32.totalorder %s3028_s19, 1 }
  0x44   : > { %s3029_s21 = sld [smem:[#allocation9_spill]] (!%p2226_p8)  ;;  %s3030_s16 = sld [smem:[#allocation19_spill]] (!%p2226_p8)  ;;  %vm2550_vm8 = vmmov (!%p2226_p8), 0  }
  0x45   : > { %s3033_s27 = sld [smem:[#allocation17_spill]] (!%p2226_p8)  ;;  %s3035_s19 = sld [smem:[#allocation21_spill]] (!%p2226_p8) }
  0xcf   : > { %v848_v5 = vpop.xlane.xlu0 %847 }
  0xd0   : > { %v850_v6 = vmul.f32 0.03125, %v848_v5 }
  0xd2   : > { %v851_v7 = vsub.f32 %v2764_v3, %v850_v6 }
  0xd4   : > { %v852_v8 = vmul.f32 %v851_v7, %v851_v7 }
  0xd6   : > { %v853_v9 = vsel %vm845_vm1, %v852_v8, 0.0  ;;  %v2182_v8 = vld [vmem:[%s2721_s3 + $0x4] ss:$0 sm:$0xff] }
  0xd7   : > { %854 = vadd.xlane.f32.xlu0 %v853_v9 }
 0x164   : > { %v855_v15 = vpop.xlane.xlu0 %854 }
 0x165   : > { %v856_v16 = vmul.f32 0.03125, %v855_v15 }
 0x167   : > { %v857_v17 = vadd.f32 1e-05, %v856_v16 }
 0x169   : > { %2487 = vrsqrt.f32 %v857_v17 }
 0x173   : > { %v2488_v18 = vpop.eup %2487 }
 0x174   : > { %v859_v20 = vmul.f32 %v2488_v18, %v851_v7 }
 0x176   : > { %v866_v22 = vmul.f32 %v2176_v19, %v859_v20 }
 0x178   : > { %v873_v23 = vadd.f32 %v2177_v21, %v866_v22 }
 0x17a   : > { %v874_v26 = vpack.c.bf16 %v873_v23, %v873_v23  ;;  %v1263_v23 = vld [vmem:[%s3024_s1] sm:$0xf]  ;;  %s3031_s1 = sld [smem:[#allocation20_spill]] (!%p2226_p8) }
 0x17c   : > { %2294 = vmatmul.mubr.msk.bf16.vlgmr.msra.gmra.mrb[0].mxu0 %vm953_vm3, %v874_v26  ;;  %2318 = vmatmul.mubr.msk.bf16.vlgmr.msra.gmra.mrb[0].mxu1 %vm953_vm3, %v874_v26 }
 0x17d   : > { %2298 = vmatpush3.bf16.msra.mxu0 %v2467_v24  ;;  %2330 = vmatpush3.bf16.msra.mxu1 %v2468_v25 }
 0x17e   : > { %2299 = vmatprep.subr.bf16.mxu0 %v2547_v12  ;;  %2331 = vmatprep.subr.bf16.mxu1 %v2547_v12 }
 0x17f   : > { %2301 = vmatprep.mubr.msk.bf16.mxu0 %vm2548_vm2, %v2547_v12  ;;  %2333 = vmatprep.mubr.msk.bf16.mxu1 %vm2548_vm2, %v2547_v12 }
 0x181   : > { %2300 = vmatpush3.bf16.msra.mxu0 %v2469_v27  ;;  %2332 = vmatpush3.bf16.msra.mxu1 %v2470_v28 }
 0x182   : > { %2305 = vmatprep.subr.bf16.mxu0 %v2547_v12  ;;  %2343 = vmatprep.subr.bf16.mxu1 %v2547_v12 }
 0x184   : > { %2302 = vmatmul.mubr.msk.bf16.vlgmr.msra.gmra.mrb[4].mxu0 %vm953_vm3, %v874_v26  ;;  %2334 = vmatmul.mubr.msk.bf16.vlgmr.msra.gmra.mrb[4].mxu1 %vm953_vm3, %v874_v26 }
 0x185   : > { %2306 = vmatpush3.bf16.msra.mxu0 %v2471_v29  ;;  %2309 = vmatprep.mubr.msk.bf16.mxu0 %vm2548_vm2, %v2547_v12 }
 0x186   : > { %2307 = vmatprep.subr.bf16.mxu0 %v2547_v12  ;;  %2345 = vmatprep.mubr.msk.bf16.mxu1 %vm2548_vm2, %v2547_v12 }
 0x189   : > { %2308 = vmatpush3.bf16.msra.mxu0 %v2472_v30 }
 0x18a   : > { %2321 = vmatprep.subr.bf16.mxu0 %v2547_v12 }
 0x18c   : > { %2310 = vmatmul.mubr.msk.bf16.vlgmr.msra.gmra.mrb[8].mxu0 %vm953_vm3, %v874_v26 }
 0x18d   : > { %2322 = vmatpush3.bf16.msra.mxu0 %v2473_v31  ;;  %2325 = vmatprep.mubr.msk.bf16.mxu0 %vm2548_vm2, %v2547_v12 }
 0x18e   : > { %2323 = vmatprep.subr.bf16.mxu0 %v2547_v12 }
 0x191   : > { %2324 = vmatpush3.bf16.msra.mxu0 %v2474_v32 }
 0x192   : > { %2337 = vmatprep.subr.bf16.mxu0 %v2547_v12 }
 0x194   : > { %2326 = vmatmul.mubr.msk.bf16.vlgmr.msra.gmra.mrb[12].mxu0 %vm953_vm3, %v874_v26 }
 0x195   : > { %2339 = vmatprep.mubr.msk.bf16.mxu0 %vm2548_vm2, %v2547_v12 }
 0x24f   : > { %v991_v34 = vpop.f32.mrb[0].mxu0  ;;  %v1147_v35 = vpop.f32.mrb[0].mxu1 }
 0x250   : > { %v1148_v36 = vadd.f32 %v2181_v33, %v1147_v35  ;;  %v2295_v37 = vpop.f32.mrb[1].mxu0  ;;  %v2319_v38 = vpop.f32.mrb[1].mxu1  ;;  %v992_v4 = vadd.f32 %v2178_v62, %v991_v34 }
 0x251   : > { %v994_v39 = vpop.f32.mrb[2].mxu0  ;;  %v1150_v40 = vpop.f32.mrb[2].mxu1 }
 0x252   : > { %v1262_v41 = vpack.c.bf16 %v1148_v36, %v1148_v36  ;;  %v2296_v42 = vpop.f32.mrb[3].mxu0  ;;  %v2320_v43 = vpop.f32.mrb[3].mxu1  ;;  %v1257_v9 = vmul.f32 0.25, %v992_v4 }
 0x254   : > { %v1315_v44 = vsel %vm1264_vm4, %v1262_v41, 0  ;;  %v1259_v15 = vpack.c.bf16 %v1257_v9, %v1257_v9 }
 0x255   : > { %2344 = vmatpush3.bf16.xpose.msra.mxu1 %v1315_v44 }
 0x256   : > { %2355 = vmatprep.subr.bf16.mxu1 %v2547_v12 }
 0x257   : > { %v1043_v47 = vpop.f32.mrb[4].mxu0  ;;  %v1251_v48 = vpop.f32.mrb[4].mxu1 }
 0x258   : > { %v1044_v49 = vadd.f32 %v2179_v45, %v1043_v47  ;;  %v1252_v50 = vadd.f32 %v2183_v46, %v1251_v48  ;;  %v2303_v51 = vpop.f32.mrb[5].mxu0  ;;  %v2335_v52 = vpop.f32.mrb[5].mxu1 }
 0x259   : > { %v1046_v53 = vpop.f32.mrb[6].mxu0  ;;  %v1254_v54 = vpop.f32.mrb[6].mxu1  ;;  %v2476_v51 = vld [vmem:[%s2716_s29 + $0x8] sm:$0xff]  }
 0x25a   : > { %v1258_v55 = vmul.f32 0.25, %v1044_v49  ;;  %v1383_v56 = vpack.c.bf16 %v1252_v50, %v1252_v50  ;;  %v2304_v57 = vpop.f32.mrb[7].mxu0  ;;  %v2336_v58 = vpop.f32.mrb[7].mxu1  ;;  %v2475_v50 = vld [vmem:[%s2716_s29] sm:$0xff]   ;;  %s3032_s29 = smov (!%p2226_p8), %s3031_s1 }
 0x25c   : > { %v1260_v59 = vpack.c.bf16 %v1258_v55, %v1258_v55  ;;  %v1436_v60 = vsel %vm1388_vm5, %v1383_v56, 0 }
 0x25e   : > { %2346 = vmatmul.mubr.msk.bf16.vlgmr.msra.gmra.mrb[8].mxu1 %vm1264_vm4, %v1260_v59 }
 0x25f   : > { %2356 = vmatpush3.bf16.msra.mxu1 %v1436_v60  ;;  %v1095_v63 = vpop.f32.mrb[8].mxu0  ;;  %2357 = vmatprep.mubr.msk.bf16.mxu1 %vm2548_vm2, %v2547_v12 }
 0x260   : > { %v1096_v0 = vadd.f32 %v2180_v61, %v1095_v63  ;;  %v2311_v1 = vpop.f32.mrb[9].mxu0  ;;  %2367 = vmatprep.subr.bf16.mxu1 %v2547_v12 }
 0x261   : > { %v1098_v2 = vpop.f32.mrb[10].mxu0 }
 0x262   : > { %v1261_v5 = vpack.c.bf16 %v1096_v0, %v1096_v0  ;;  %v2312_v6 = vpop.f32.mrb[11].mxu0 }
 0x263   : > { %v2210_v6 = vld [vmem:[%s3025_s4] ss:$0 sm:$0xff] }
 0x264   : > { %v1269_v7 = vsel %vm1264_vm4, %v1261_v5, 0 }
 0x265   : > { %2338 = vmatpush3.bf16.xpose.msra.mxu0 %v1269_v7 }
 0x266   : > { %2349 = vmatprep.subr.bf16.mxu0 %v2547_v12 }
 0x267   : > { %v1199_v10 = vpop.f32.mrb[12].mxu0 }
 0x268   : > { %v1200_v11 = vadd.f32 %v2182_v8, %v1199_v10  ;;  %v2327_v13 = vpop.f32.mrb[13].mxu0 }
 0x269   : > { %v1202_v14 = vpop.f32.mrb[14].mxu0 }
 0x26a   : > { %v1382_v16 = vpack.c.bf16 %v1200_v11, %v1200_v11  ;;  %v2328_v17 = vpop.f32.mrb[15].mxu0 }
 0x26c   : > { %v1390_v18 = vsel %vm1388_vm5, %v1382_v16, 0  ;;  %2340 = vmatmul.mubr.msk.bf16.vlgmr.msra.gmra.mrb[16].mxu0 %vm1264_vm4, %v1259_v15 }
 0x26d   : > { %2350 = vmatpush3.bf16.msra.mxu0 %v1390_v18  ;;  %2351 = vmatprep.mubr.msk.bf16.mxu0 %vm2548_vm2, %v2547_v12  ;;  %v2477_v18 = vld [vmem:[%s2738_s5] sm:$0xff]  }
 0x26e   : > { %2361 = vmatprep.subr.bf16.mxu0 %v2547_v12 }
 0x331   : > { %v1351_v19 = vpop.f32.mrb[8].mxu1 }
 0x332   : > { %v2347_v20 = vpop.f32.mrb[9].mxu1  ;;  %v1352_v28 = vadd.f32 %v1351_v19, %v1263_v23  ;;  %v2479_v19 = vld [vmem:[%s2752_s17] sm:$0xff]  }
 0x333   : > { %v1354_v21 = vpop.f32.mrb[10].mxu1 }
 0x334   : > { %v2348_v22 = vpop.f32.mrb[11].mxu1  ;;  %v1361_v31 = vsel %vm1357_vm6, %v1352_v28, -inf }
 0x33f   : > { %v1305_v24 = vpop.f32.mrb[16].mxu0 }
 0x340   : > { %v1306_v25 = vadd.f32 %v1305_v24, %v1263_v23  ;;  %v2341_v26 = vpop.f32.mrb[17].mxu0  ;;  %v2211_v24 = vld [vmem:[%s3026_s6] ss:$0 sm:$0xff] }
 0x341   : > { %v1308_v27 = vpop.f32.mrb[18].mxu0  ;;  %v2212_v26 = vld [vmem:[%s811_s25] ss:$0 sm:$0xff] }
 0x342   : > { %v2342_v29 = vpop.f32.mrb[19].mxu0  ;;  %v1358_v30 = vsel %vm1357_vm6, %v1306_v25, -inf }
 0x343   : > { %1359 = vmax.xlane.f32.xlu1 %v1358_v30  ;;  %v2480_v30 = vld [vmem:[%s2752_s17 + $0x8] sm:$0xff]  }
 0x347   : > { %1362 = vmax.xlane.f32.xlu1 %v1361_v31  ;;  %v2481_v31 = vld [vmem:[%s2752_s17 + $0x10] sm:$0xff]  }
 0x3d0   : > { %v1360_v32 = vpop.xlane.xlu1 %1359 }
 0x3d1   : > { %v1364_v33 = vsub.f32 %v1306_v25, %v1360_v32  ;;  %v2482_v32 = vld [vmem:[%s2752_s17 + $0x18] sm:$0xff]  }
 0x3d3   : > { %v1366_v34 = vmul.f32 1.442695, %v1364_v33  ;;  %v2483_v33 = vld [vmem:[%s2752_s17 + $0x20] sm:$0xff]  }
 0x3d4   : > { %v1363_v35 = vpop.xlane.xlu1 %1362 }
 0x3d5   : > { %2489 = vpow2.f32 %v1366_v34  ;;  %v1365_v36 = vsub.f32 %v1352_v28, %v1363_v35  ;;  %v2484_v34 = vld [vmem:[%s2752_s17 + $0x28] sm:$0xff]   ;;  %v2485_v35 = vld [vmem:[%s2752_s17 + $0x30] sm:$0xff]  }
 0x3d7   : > { %v1368_v37 = vmul.f32 1.442695, %v1365_v36  ;;  %v2486_v36 = vld [vmem:[%s2752_s17 + $0x38] sm:$0xff]  }
 0x3d9   : > { %2491 = vpow2.f32 %v1368_v37  ;;  %v2213_v37 = vld [vmem:[%s3027_s23] ss:$0 sm:$0xff]  ;;  %s3034_s23 = sld [smem:[#allocation18_spill]] (!%p2226_p8) }
 0x3df   : > { %v2490_v38 = vpop.eup %2489 }
 0x3e0   : > { %v1370_v39 = vsel %vm1357_vm6, %v2490_v38, 0.0 }
 0x3e1   : > { %1371 = vadd.xlane.f32.xlu0 %v1370_v39 }
 0x3e3   : > { %v2492_v40 = vpop.eup %2491 }
 0x3e4   : > { %v1373_v41 = vsel %vm1357_vm6, %v2492_v40, 0.0 }
 0x3e5   : > { %1374 = vadd.xlane.f32.xlu1 %v1373_v41 }
 0x46e   : > { %v1372_v42 = vpop.xlane.xlu0 %1371 }
 0x46f   : > { %2493 = vrcp.f32 %v1372_v42 }
 0x472   : > { %v1375_v43 = vpop.xlane.xlu1 %1374 }
 0x473   : > { %2495 = vrcp.f32 %v1375_v43 }
 0x479   : > { %v2494_v44 = vpop.eup %2493 }
 0x47a   : > { %v1378_v45 = vmul.f32 %v2494_v44, %v2490_v38 }
 0x47c   : > { %v1380_v46 = vpack.c.bf16 %v1378_v45, %v1378_v45 }
 0x47d   : > { %v2496_v47 = vpop.eup %2495 }
 0x47e   : > { %v1379_v48 = vmul.f32 %v2496_v47, %v2492_v40  ;;  %2352 = vmatmul.mubr.msk.bf16.vlgmr.msra.gmra.mrb[20].mxu0 %vm1384_vm7, %v1380_v46 }
 0x47f   : > { %2363 = vmatprep.mubr.msk.bf16.mxu0 %vm2548_vm2, %v2547_v12  ;;  %2362 = vmatpush3.bf16.msra.mxu0 %v2475_v50 }
 0x480   : > { %v1381_v49 = vpack.c.bf16 %v1379_v48, %v1379_v48  ;;  %2373 = vmatprep.subr.bf16.mxu0 %v2547_v12 }
 0x482   : > { %2358 = vmatmul.mubr.msk.bf16.vlgmr.msra.gmra.mrb[12].mxu1 %vm1384_vm7, %v1381_v49 }
 0x483   : > { %2369 = vmatprep.mubr.msk.bf16.mxu1 %vm2548_vm2, %v2547_v12  ;;  %2368 = vmatpush3.bf16.msra.mxu1 %v2476_v51 }
 0x484   : > { %2381 = vmatprep.subr.bf16.mxu1 %v2547_v12 }
 0x551   : > { %v1426_v52 = vpop.f32.mrb[20].mxu0 }
 0x552   : > { %v1478_v53 = vpack.c.bf16 %v1426_v52, %v1426_v52  ;;  %v2353_v54 = vpop.f32.mrb[21].mxu0  ;;  %v2217_v52 = vld [vmem:[%s827_s2] ss:$0 sm:$0xff] }
 0x553   : > { %v1429_v55 = vpop.f32.mrb[22].mxu0 }
 0x554   : > { %v2354_v56 = vpop.f32.mrb[23].mxu0  ;;  %2364 = vmatmul.mubr.msk.bf16.vlgmr.msra.gmra.mrb[24].mxu0 %vm1264_vm4, %v1478_v53 }
 0x555   : > { %v1472_v57 = vpop.f32.mrb[12].mxu1  ;;  %2377 = vmatprep.mubr.msk.bf16.mxu0 %vm2548_vm2, %v2547_v12  ;;  %2374 = vmatpush3.bf16.msra.mxu0 %v2477_v18 }
 0x556   : > { %v1479_v58 = vpack.c.bf16 %v1472_v57, %v1472_v57  ;;  %v2359_v59 = vpop.f32.mrb[13].mxu1  ;;  %2375 = vmatprep.subr.bf16.mxu0 %v2547_v12 }
 0x557   : > { %v1475_v60 = vpop.f32.mrb[14].mxu1 }
 0x558   : > { %v2360_v61 = vpop.f32.mrb[15].mxu1  ;;  %2370 = vmatmul.mubr.msk.bf16.vlgmr.msra.gmra.mrb[16].mxu1 %vm1264_vm4, %v1479_v58 }
 0x559   : > { %2397 = vmatprep.mubr.msk.bf16.mxu1 %vm2548_vm2, %v2547_v12  ;;  %2382 = vmatpush3.bf16.msra.mxu1 %v2479_v19 }
 0x55a   : > { %2383 = vmatprep.subr.bf16.mxu1 %v2547_v12 }
 0x55d   : > { %2384 = vmatpush3.bf16.msra.mxu1 %v2480_v30 }
 0x55e   : > { %2385 = vmatprep.subr.bf16.mxu1 %v2547_v12 }
 0x561   : > { %2386 = vmatpush3.bf16.msra.mxu1 %v2481_v31 }
 0x562   : > { %2387 = vmatprep.subr.bf16.mxu1 %v2547_v12 }
 0x565   : > { %2388 = vmatpush3.bf16.msra.mxu1 %v2482_v32 }
 0x566   : > { %2389 = vmatprep.subr.bf16.mxu1 %v2547_v12 }
 0x569   : > { %2390 = vmatpush3.bf16.msra.mxu1 %v2483_v33 }
 0x56a   : > { %2391 = vmatprep.subr.bf16.mxu1 %v2547_v12 }
 0x56d   : > { %2392 = vmatpush3.bf16.msra.mxu1 %v2484_v34 }
 0x56e   : > { %2393 = vmatprep.subr.bf16.mxu1 %v2547_v12 }
 0x571   : > { %2394 = vmatpush3.bf16.msra.mxu1 %v2485_v35 }
 0x572   : > { %2395 = vmatprep.subr.bf16.mxu1 %v2547_v12 }
 0x575   : > { %2396 = vmatpush3.bf16.msra.mxu1 %v2486_v36 }
 0x627   : > { %v1527_v62 = vpop.f32.mrb[24].mxu0 }
 0x628   : > { %v2365_v63 = vpop.f32.mrb[25].mxu0 }
 0x629   : > { %v1530_v0 = vpop.f32.mrb[26].mxu0 }
 0x62a   : > { %v2366_v1 = vpop.f32.mrb[27].mxu0 }
 0x62b   : > { %v1576_v2 = vpop.f32.mrb[16].mxu1  ;;  %v2501_v1 = vld [vmem:[%s3030_s16] sm:$0xff] (!%p2226_p8)  }
 0x62c   : > { %v1582_v4 = vadd.f32 %v1576_v2, %v1527_v62  ;;  %v2371_v5 = vpop.f32.mrb[17].mxu1  ;;  %v2502_v2 = vld [vmem:[%s3031_s1] sm:$0xff] (!%p2226_p8)  }
 0x62d   : > { %v1579_v7 = vpop.f32.mrb[18].mxu1  ;;  %v2503_v5 = vld [vmem:[%s3030_s16 + $0x8] sm:$0xff] (!%p2226_p8)  }
 0x62e   : > { %v1583_v8 = vadd.f32 %v1582_v4, %v2764_v3  ;;  %v2372_v9 = vpop.f32.mrb[19].mxu1  ;;  %v2478_v3 = vld [vmem:[%s2738_s5 + $0x8] sm:$0xff]   ;;  %v2549_v4 = vmov (!%p2226_p8), 0.0   ;;  %v1844_v7 = vld [vmem:[%s3029_s21] sm:$0xf] (!%p2226_p8) }
 0x62f   : > { %2376 = vmatpush3.bf16.msra.mxu0 %v2478_v3  ;;  %2409 = vmatprep.subr.bf16.mxu1 (!%p2226_p8), %v2549_v4 }
 0x630   : > { %v2875_v10 = vadd.f32 %v2210_v6, %v1583_v8  ;;  %2401 = vmatprep.subr.bf16.mxu0 (!%p2226_p8), %v2549_v4  ;;  %v2504_v6 = vld [vmem:[%s3032_s29 + $0x8] sm:$0xff] (!%p2226_p8)   ;;  %v1845_v8 = vpack.c.bf16 (!%p2226_p8), %v1844_v7, %v1844_v7 }
 0x632   : > { %v1594_v11 = vsel %vm845_vm1, %v2875_v10, 0.0 }
 0x633   : > { %1595 = vadd.xlane.f32.xlu0 %v1594_v11 }
 0x6c0   : > { %v1596_v13 = vpop.xlane.xlu0 %1595 }
 0x6c1   : > { %v1597_v14 = vmul.f32 0.03125, %v1596_v13 }
 0x6c3   : > { %v1598_v15 = vsub.f32 %v2875_v10, %v1597_v14  ;;  %v2227_v14 = vld [vmem:[%s3033_s27] ss:$0 sm:$0xff] (!%p2226_p8) }
 0x6c5   : > { %v1599_v16 = vmul.f32 %v1598_v15, %v1598_v15 }
 0x6c7   : > { %v1600_v17 = vsel %vm845_vm1, %v1599_v16, 0.0  ;;  %v2228_v16 = vld [vmem:[%s3034_s23] ss:$0 sm:$0xff] (!%p2226_p8) }
 0x6c8   : > { %1601 = vadd.xlane.f32.xlu1 %v1600_v17 }
 0x755   : > { %v1602_v20 = vpop.xlane.xlu1 %1601 }
 0x756   : > { %v1603_v21 = vmul.f32 0.03125, %v1602_v20 }
 0x758   : > { %v1604_v22 = vadd.f32 1e-05, %v1603_v21 }
 0x75a   : > { %2497 = vrsqrt.f32 %v1604_v22 }
 0x764   : > { %v2498_v23 = vpop.eup %2497 }
 0x765   : > { %v1606_v25 = vmul.f32 %v2498_v23, %v1598_v15 }
 0x767   : > { %v1613_v27 = vmul.f32 %v2211_v24, %v1606_v25  ;;  %v2235_v24 = vld [vmem:[%s3035_s19] ss:$0 sm:$0xff] (!%p2226_p8) }
 0x769   : > { %v1620_v28 = vadd.f32 %v2212_v26, %v1613_v27 }
 0x76b   : > { %v1621_v29 = vpack.c.bf16 %v1620_v28, %v1620_v28 }
 0x76d   : > { %2378 = vmatmul.mubr.msk.bf16.vlgmr.msra.gmra.mrb[28].mxu0 %vm953_vm3, %v1621_v29 }
 0x76e   : > { %2402 = vmatpush3.bf16.msra.mxu0 (!%p2226_p8), %v2502_v2  ;;  %2405 = vmatprep.mubr.msk.bf16.mxu0 (!%p2226_p8), %vm2550_vm8, %v2549_v4 }
 0x76f   : > { %2403 = vmatprep.subr.bf16.mxu0 (!%p2226_p8), %v2549_v4 }
 0x772   : > { %2404 = vmatpush3.bf16.msra.mxu0 (!%p2226_p8), %v2504_v6 }
 0x840   : > { %v1682_v38 = vpop.f32.mrb[28].mxu0 }
 0x841   : > { %v1683_v39 = vadd.f32 %v2213_v37, %v1682_v38  ;;  %v2379_v40 = vpop.f32.mrb[29].mxu0 }
 0x842   : > { %v1685_v41 = vpop.f32.mrb[30].mxu0 }
 0x843   : > { %v1689_v42 = vmul.f32 0.044715, %v1683_v39  ;;  %v2380_v43 = vpop.f32.mrb[31].mxu0  ;;  %v1688_v12 = vmul.f32 0.5, %v1683_v39 }
 0x845   : > { %v1690_v44 = vmul.f32 %v1689_v42, %v1683_v39 }
 0x847   : > { %v1691_v45 = vmul.f32 %v1690_v44, %v1683_v39 }
 0x849   : > { %v1692_v46 = vadd.f32 %v1691_v45, %v1683_v39 }
 0x84b   : > { %v1693_v47 = vmul.f32 0.7978846, %v1692_v46 }
 0x84d   : > { %2499 = vtanh.f32 %v1693_v47 }
 0x857   : > { %v2500_v48 = vpop.eup %2499 }
 0x858   : > { %v1695_v49 = vadd.f32 1.0, %v2500_v48 }
 0x85a   : > { %v1696_v50 = vmul.f32 %v1695_v49, %v1688_v12 }
 0x85c   : > { %v1697_v51 = vpack.c.bf16 %v1696_v50, %v1696_v50 }
 0x85e   : > { %2398 = vmatmul.mubr.bf16.vlgmr.msra.gmra.mrb[20].mxu1 %v1697_v51 }
 0x85f   : > { %2410 = vmatpush3.bf16.msra.mxu1 (!%p2226_p8), %v2501_v1  ;;  %2413 = vmatprep.mubr.msk.bf16.mxu1 (!%p2226_p8), %vm2550_vm8, %v2549_v4 }
 0x860   : > { %2411 = vmatprep.subr.bf16.mxu1 (!%p2226_p8), %v2549_v4 }
 0x863   : > { %2412 = vmatpush3.bf16.msra.mxu1 (!%p2226_p8), %v2503_v5 }
 0x866   : > { %2414 = vmatmul.mubr.msk.bf16.vlgmr.msra.gmra.mrb[0].mxu1 (!%p2226_p8), %vm953_vm3, %v1845_v8 }
 0x930   : > { %1814 = sbr.rel (%p2226_p8) target bundleno = 2890 (0xb4a), region = 108 }
 0x931   : > { %v1803_v53 = vpop.f32.mrb[20].mxu1 }
 0x932   : > { %v1804_v54 = vadd.f32 %v2217_v52, %v1803_v53  ;;  %v2399_v55 = vpop.f32.mrb[21].mxu1 }
 0x933   : > { %v1806_v56 = vpop.f32.mrb[22].mxu1 }
 0x934   : > { %v1809_v57 = vadd.f32 %v1804_v54, %v2875_v10  ;;  %v2400_v58 = vpop.f32.mrb[23].mxu1 }
 0x936   : > { %1810 = vst.msk [vmem:[#allocation2] sm:$0xf] %vm845_vm1, %v1809_v57  ;;  %v1817_v59 = vsel (!%p2226_p8), %vm845_vm1, %v1809_v57, 0.0 }
 0x937   : > { %1818 = vadd.xlane.f32.xlu0 %v1817_v59 }
 0x939   : > { %v1959_v19 = vpop.f32.mrb[0].mxu1 }
 0x93a   : > { %v2415_v20 = vpop.f32.mrb[1].mxu1 }
 0x93b   : > { %v1962_v21 = vpop.f32.mrb[2].mxu1 }
 0x93c   : > { %v2416_v22 = vpop.f32.mrb[3].mxu1 }
 0x9c4   : > { %v1819_v60 = vpop.xlane.xlu0 %1818 }
 0x9c5   : > { %v1820_v61 = vmul.f32 0.03125, %v1819_v60 }
 0x9c7   : > { %v1821_v62 = vsub.f32 %v1809_v57, %v1820_v61 }
 0x9c9   : > { %v1822_v63 = vmul.f32 %v1821_v62, %v1821_v62 }
 0x9cb   : > { %v1823_v0 = vsel %vm845_vm1, %v1822_v63, 0.0 }
 0x9cc   : > { %1824 = vadd.xlane.f32.xlu0 %v1823_v0 }
 0xa59   : > { %v1825_v9 = vpop.xlane.xlu0 %1824 }
 0xa5a   : > { %v1826_v10 = vmul.f32 0.03125, %v1825_v9 }
 0xa5c   : > { %v1827_v11 = vadd.f32 1e-05, %v1826_v10 }
 0xa5e   : > { %2505 = vrsqrt.f32 %v1827_v11 }
 0xa68   : > { %v2506_v13 = vpop.eup %2505 }
 0xa69   : > { %v1829_v15 = vmul.f32 %v2506_v13, %v1821_v62 }
 0xa6b   : > { %v1836_v17 = vmul.f32 %v2227_v14, %v1829_v15 }
 0xa6d   : > { %v1843_v18 = vadd.f32 %v2228_v16, %v1836_v17 }
 0xa6f   : > { %v1850_v3 = vpack.c.bf16 %v1843_v18, %v1843_v18 }
 0xa71   : > { %2406 = vmatmul.mubr.msk.bf16.vlgmr.msra.gmra.mrb[0].mxu0 %vm953_vm3, %v1850_v3 }
 0xb44   : > { %v1904_v23 = vpop.f32.mrb[0].mxu0 }
 0xb45   : > { %v1960_v25 = vadd.f32 %v1959_v19, %v1904_v23  ;;  %v2407_v26 = vpop.f32.mrb[1].mxu0 }
 0xb46   : > { %v1907_v27 = vpop.f32.mrb[2].mxu0 }
 0xb47   : > { %v1972_v28 = vadd.f32 %v2235_v24, %v1960_v25  ;;  %v2408_v29 = vpop.f32.mrb[3].mxu0 }
 0xb49   : > { %1973 = vst.msk [vmem:[%s2757_s28] sm:$0xf] %vm845_vm1, %v1972_v28 }
 0xb4a PF: > { %s3036_s21 = sld [smem:[#allocation6_spill]]  ;;  %s3037_s1 = sld [smem:[#allocation4_spill]] }
 0xb4b   : > { %s3038_s22 = sld [smem:[#allocation5_spill]]  ;;  %s3039_s23 = sld [smem:[#allocation7_spill]] }
 0xb4c   : > { %s3040_s24 = sld [smem:[#allocation8_spill]] }
 0xb50   : > { %s30_s2 = sadd.s32 1, %s3036_s21  }
 0xb51   : > { %p27_p9 = scmp.ge.s32.totalorder %s30_s2, 6  }
 0xb53   :  { %29 = sbr.rel (!%p27_p9) target bundleno = 13 (0xd), region = 174 }

</bundles_post_ra>
